<compile_context>
chip_gen: v5e
topology: v5e:2x2
jax: 0.10.0
libtpu: 0.0.40
codegen_flags: <defaults>
</compile_context>

<pallas_src>
import functools

import jax
import jax.numpy as jnp
from jax import lax
from jax.experimental import pallas as pl
from jax.experimental.pallas import tpu as pltpu


def _inception_kernel(x_ref, w_ref, b_ref, o_ref, rhs_ref, *, width, cin):
    # x_ref  : (1, Cin, L) f32, L = (H+4)*W + 4 (H zero-padded by 2 rows each
    #          side, flattened row-major, flat axis padded by 2 each end so
    #          every tap below is a static in-bounds lane slice).
    # w_ref  : (C4, K) bf16 fused weight; column (dy*5+dx)*Cin + c holds the
    #          BN-scale-folded tap weight, columns >= 25*Cin are zero.
    # b_ref  : (C4, 1) f32 folded BN bias.
    # o_ref  : (1, C4, HW) f32 output block, channel order [1x1, 5x5, 3x3, pool].
    # rhs_ref: (K, HW) f32 VMEM scratch holding the im2col stack.
    C4 = o_ref.shape[1]
    HW = o_ref.shape[2]
    K = rhs_ref.shape[0]
    W = width

    xflat = x_ref[0]                                     # (Cin, L), loaded once

    # Column index of every output pixel.  The dx masks reproduce the conv's
    # zero padding along W; hoisted so only 4 compare/and pairs are done total.
    wcol = lax.broadcasted_iota(jnp.int32, (1, HW), 1) % W
    masks = [None] * 5
    for dx in range(5):
        if dx != 2:                                      # center tap: no mask
            masks[dx] = (wcol >= 2 - dx) & (wcol < W + 2 - dx)

    # Zero the contraction-padding rows (their weight columns are zero, but
    # keep the stack deterministic — scratch persists across grid steps).
    if K > 25 * cin:
        rhs_ref[25 * cin:, :] = jnp.zeros((K - 25 * cin, HW), rhs_ref.dtype)

    # im2col build: each tap is a static lane-shifted slice of the flat row,
    # masked where the 5x5/3x3 window would read across a row boundary.
    t = 0
    for dy in range(5):
        for dx in range(5):
            band = xflat[:, dy * W + dx: dy * W + dx + HW]        # (Cin, HW)
            if dx != 2:
                band = jnp.where(masks[dx], band, 0.0)
            rhs_ref[t * cin:(t + 1) * cin, :] = band
            t += 1

    # Single fused MXU matmul: (C4, K) x (K, HW) -> (C4, HW), f32 accumulation.
    acc = jnp.dot(w_ref[...], rhs_ref[...].astype(jnp.bfloat16),
                  preferred_element_type=jnp.float32)

    # Epilogue: folded-BN bias + ReLU, one lane-dense f32 store.
    o_ref[0] = jnp.maximum(acc + b_ref[...], 0.0).astype(o_ref.dtype)


def prepare_inception_params(w1, w3, w5, wp, scale, bias):
    """Fold the 4 branches + inference-mode BN scale into one (C4, K) bf16 weight.

    Branch/channel order is [1x1, 5x5, 3x3, pool] to match the PyTorch concat.
    avg_pool(3,1,1) (count_include_pad=True) + 1x1 conv is fused as a uniform
    3x3 kernel of wp/9.  Call ONCE; reuse the result for every forward.
    """
    Cin, C = w1.shape
    C4 = 4 * C
    K = 25 * Cin
    k_pad = ((K + 127) // 128) * 128

    wtap = jnp.zeros((5, 5, Cin, C4), jnp.float32)
    wtap = wtap.at[:, :, :, C:2 * C].set(w5)                           # 5x5, pad=2
    wtap = wtap.at[1:4, 1:4, :, 2 * C:3 * C].set(w3)                   # 3x3, pad=1
    wtap = wtap.at[1:4, 1:4, :, 3 * C:4 * C].set(                      # avgpool+1x1
        jnp.broadcast_to(wp / 9.0, (3, 3, Cin, C)))
    wtap = wtap.at[2, 2, :, 0:C].set(w1)                               # 1x1
    wtap = wtap * scale[None, None, None, :]                           # fold BN scale

    wk = wtap.reshape(K, C4)                       # row = (dy*5+dx)*Cin + c
    wk = jnp.pad(wk, ((0, k_pad - K), (0, 0)))     # zero-pad contraction to 128
    w_fused = wk.T.astype(jnp.bfloat16)            # (C4, k_pad)
    b_fused = bias.reshape(C4, 1).astype(jnp.float32)
    return w_fused, b_fused


@jax.jit
def inception_base(x_nchw, w_fused, b_fused):
    """x_nchw: (N, Cin, H, W) f32 (PyTorch layout). Returns (N, 4C, H, W) f32."""
    N, Cin, H, W = x_nchw.shape
    C4, K = w_fused.shape
    HW = H * W
    L = (H + 4) * W + 4

    # Activation prep: zero-pad H by 2, flatten rows, pad the flat axis by 2 so
    # every (dy, dx) tap in the kernel is a static in-bounds lane slice.
    xp = jnp.pad(x_nchw, ((0, 0), (0, 0), (2, 2), (0, 0)))             # (N,Cin,H+4,W)
    xp = xp.reshape(N, Cin, (H + 4) * W)
    xp = jnp.pad(xp, ((0, 0), (0, 0), (2, 2)))                         # (N,Cin,L)

    grid_spec = pltpu.PrefetchScalarGridSpec(
        num_scalar_prefetch=0,
        grid=(N,),
        in_specs=[
            pl.BlockSpec((1, Cin, L), lambda n: (n, 0, 0)),
            # Constant block index: weight/bias are revisited across grid
            # steps, not re-DMA'd per step.
            pl.BlockSpec((C4, K), lambda n: (0, 0)),
            pl.BlockSpec((C4, 1), lambda n: (0, 0)),
        ],
        out_specs=pl.BlockSpec((1, C4, HW), lambda n: (n, 0, 0)),
        scratch_shapes=[pltpu.VMEM((K, HW), jnp.float32)],
    )

    out = pl.pallas_call(
        functools.partial(_inception_kernel, width=W, cin=Cin),
        out_shape=jax.ShapeDtypeStruct((N, C4, HW), jnp.float32),
        grid_spec=grid_spec,
        # One image per grid step; "parallel" lets v7x's two TensorCores split
        # the batch (N=2 -> one image per core).
        compiler_params=pltpu.CompilerParams(
            dimension_semantics=("parallel",)),
    )(xp, w_fused, b_fused)

    # Free (contiguous) reshape back to NCHW, as the PyTorch module returns.
    return out.reshape(N, C4, H, W)


# ---------------------------------------------------------------------------
# Pure-JAX reference (mirrors the PyTorch forward) using the SAME folded-scale
# bf16 effective weights / bf16 activations with f32 accumulation, so the
# comparison with the kernel is tight.
# ---------------------------------------------------------------------------
def _conv_nchw(x, w, pad):
    return lax.conv_general_dilated(
        x, w, window_strides=(1, 1), padding=[(pad, pad), (pad, pad)],
        dimension_numbers=("NCHW", "HWIO", "NCHW"),
        preferred_element_type=jnp.float32)


def inception_base_ref(x_nchw, w1, w3, w5, wp, scale, bias):
    Cin, C = w1.shape
    xb = x_nchw.astype(jnp.bfloat16)

    def eff(w, c0):  # fold BN scale, then bf16 — same as the kernel params
        return (w * scale[c0:c0 + C]).astype(jnp.bfloat16)

    def post(y, c0):
        return jnp.maximum(y + bias[c0:c0 + C].reshape(1, C, 1, 1), 0.0)

    b1 = post(_conv_nchw(xb, eff(w1.reshape(1, 1, Cin, C), 0), 0), 0)
    b5 = post(_conv_nchw(xb, eff(w5, C), 2), C)
    b3 = post(_conv_nchw(xb, eff(w3, 2 * C), 1), 2 * C)
    # avg_pool2d(3,1,1, count_include_pad=True) + 1x1 conv == 3x3 conv whose
    # every tap is wp/9 (distributivity) — exactly how the kernel fuses it.
    wpool = jnp.broadcast_to((wp / 9.0).reshape(1, 1, Cin, C), (3, 3, Cin, C))
    bp = post(_conv_nchw(xb, eff(wpool, 3 * C), 1), 3 * C)
    return jnp.concatenate([b1, b5, b3, bp], axis=1)


if __name__ == "__main__":
    # Small shapes consistent with the module's forward.
    N, Cin, H, W = 2, 4, 16, 16
    out_channels = 16
    C = out_channels // 4
    eps = 1e-3

    key = jax.random.PRNGKey(0)
    ks = jax.random.split(key, 9)

    # Input in PyTorch's native NCHW layout.
    x = jax.random.normal(ks[0], (N, Cin, H, W), jnp.float32)

    # Conv weights (HWIO / IO), deterministic init.
    w1 = 0.1 * jax.random.normal(ks[1], (Cin, C), jnp.float32)        # 1x1
    w3 = 0.1 * jax.random.normal(ks[2], (3, 3, Cin, C), jnp.float32)  # 3x3
    w5 = 0.1 * jax.random.normal(ks[3], (5, 5, Cin, C), jnp.float32)  # 5x5
    wp = 0.1 * jax.random.normal(ks[4], (Cin, C), jnp.float32)        # pool 1x1

    # BatchNorm (inference mode) parameters, per output channel, in the output
    # concat order [1x1, 5x5, 3x3, pool].
    gamma = 1.0 + 0.1 * jax.random.normal(ks[5], (out_channels,), jnp.float32)
    beta = 0.1 * jax.random.normal(ks[6], (out_channels,), jnp.float32)
    run_mean = 0.1 * jax.random.normal(ks[7], (out_channels,), jnp.float32)
    run_var = 0.5 + jnp.abs(jax.random.normal(ks[8], (out_channels,), jnp.float32))

    scale = gamma / jnp.sqrt(run_var + eps)
    bias = beta - run_mean * scale

    # Fused weight/bias built ONCE, outside the per-forward call path.
    w_fused, b_fused = prepare_inception_params(w1, w3, w5, wp, scale, bias)

    out = jax.block_until_ready(inception_base(x, w_fused, b_fused))
    ref = jax.block_until_ready(inception_base_ref(x, w1, w3, w5, wp, scale, bias))

    assert out.shape == (N, out_channels, H, W), out.shape
    max_err = float(jnp.max(jnp.abs(out - ref)))
    assert max_err < 1e-3, max_err

    print("KERNEL_OK")
</pallas_src>

<mosaic_0001>
module attributes {stable_mosaic.version = 11 : i64} {
  func.func @_inception_kernel(%arg0: i32, %arg1: memref<1x4x324xf32, #tpu.memory_space<vmem>>, %arg2: memref<16x128xbf16, #tpu.memory_space<vmem>>, %arg3: memref<16x1xf32, #tpu.memory_space<vmem>>, %arg4: memref<1x16x256xf32, #tpu.memory_space<vmem>>, %arg5: memref<128x256xf32, #tpu.memory_space<vmem>>) attributes {dimension_semantics = [#tpu.dimension_semantics<parallel>], iteration_bounds = array<i64: 2>, scalar_prefetch = 0 : i64, scratch_operands = 1 : i64, tpu.core_type = #tpu.core_type<tc>, window_params = [{transform_indices = @transform_0, window_bounds = array<i64: 1, 4, 324>}, {pipeline_mode = #tpu.pipeline_mode<synchronous>, transform_indices = @transform_1, window_bounds = array<i64: 16, 128>}, {pipeline_mode = #tpu.pipeline_mode<synchronous>, transform_indices = @transform_2, window_bounds = array<i64: 16, 1>}, {transform_indices = @transform_3, window_bounds = array<i64: 1, 16, 256>}]} {
    %c0 = arith.constant 0 : index
    %c0_0 = arith.constant 0 : index
    %c0_1 = arith.constant 0 : index
    %0 = vector.load %arg1[%c0, %c0_0, %c0_1] : memref<1x4x324xf32, #tpu.memory_space<vmem>>, vector<1x4x324xf32>
    %1 = vector.shape_cast %0 : vector<1x4x324xf32> to vector<4x324xf32>
    %2 = tpu.iota {dimensions = array<i32: 1>} : vector<1x256xi32>
    %c16_i32 = arith.constant 16 : i32
    %c0_i32 = arith.constant 0 : i32
    %3 = arith.cmpi eq, %c16_i32, %c0_i32 : i32
    %c1_i32 = arith.constant 1 : i32
    %4 = arith.select %3, %c1_i32, %c16_i32 : i32
    %5 = vector.broadcast %4 : i32 to vector<1x256xi32>
    %6 = arith.remsi %2, %5 : vector<1x256xi32>
    %c0_i32_2 = arith.constant 0 : i32
    %7 = vector.broadcast %c0_i32_2 : i32 to vector<1x256xi32>
    %8 = arith.cmpi ne, %6, %7 : vector<1x256xi32>
    %c0_i32_3 = arith.constant 0 : i32
    %9 = vector.broadcast %c0_i32_3 : i32 to vector<1x256xi32>
    %10 = arith.cmpi slt, %6, %9 : vector<1x256xi32>
    %c0_i32_4 = arith.constant 0 : i32
    %11 = arith.cmpi slt, %4, %c0_i32_4 : i32
    %12 = vector.broadcast %11 : i1 to vector<1x256xi1>
    %13 = vector.broadcast %12 : vector<1x256xi1> to vector<1x256xi1>
    %14 = arith.xori %10, %13 : vector<1x256xi1>
    %15 = arith.andi %14, %8 : vector<1x256xi1>
    %16 = vector.broadcast %4 : i32 to vector<1x256xi32>
    %17 = arith.addi %6, %16 : vector<1x256xi32>
    %18 = arith.select %15, %17, %6 : vector<1x256xi1>, vector<1x256xi32>
    %c2_i32 = arith.constant 2 : i32
    %19 = vector.broadcast %c2_i32 : i32 to vector<1x256xi32>
    %20 = arith.cmpi sge, %18, %19 : vector<1x256xi32>
    %c18_i32 = arith.constant 18 : i32
    %21 = vector.broadcast %c18_i32 : i32 to vector<1x256xi32>
    %22 = arith.cmpi slt, %18, %21 : vector<1x256xi32>
    %23 = arith.andi %20, %22 : vector<1x256xi1>
    %c1_i32_5 = arith.constant 1 : i32
    %24 = vector.broadcast %c1_i32_5 : i32 to vector<1x256xi32>
    %25 = arith.cmpi sge, %18, %24 : vector<1x256xi32>
    %c17_i32 = arith.constant 17 : i32
    %26 = vector.broadcast %c17_i32 : i32 to vector<1x256xi32>
    %27 = arith.cmpi slt, %18, %26 : vector<1x256xi32>
    %28 = arith.andi %25, %27 : vector<1x256xi1>
    %c-1_i32 = arith.constant -1 : i32
    %29 = vector.broadcast %c-1_i32 : i32 to vector<1x256xi32>
    %30 = arith.cmpi sge, %18, %29 : vector<1x256xi32>
    %c15_i32 = arith.constant 15 : i32
    %31 = vector.broadcast %c15_i32 : i32 to vector<1x256xi32>
    %32 = arith.cmpi slt, %18, %31 : vector<1x256xi32>
    %33 = arith.andi %30, %32 : vector<1x256xi1>
    %c-2_i32 = arith.constant -2 : i32
    %34 = vector.broadcast %c-2_i32 : i32 to vector<1x256xi32>
    %35 = arith.cmpi sge, %18, %34 : vector<1x256xi32>
    %c14_i32 = arith.constant 14 : i32
    %36 = vector.broadcast %c14_i32 : i32 to vector<1x256xi32>
    %37 = arith.cmpi slt, %18, %36 : vector<1x256xi32>
    %38 = arith.andi %35, %37 : vector<1x256xi1>
    %cst = arith.constant 0.000000e+00 : f32
    %39 = vector.broadcast %cst : f32 to vector<28x256xf32>
    %c100 = arith.constant 100 : index
    %c0_6 = arith.constant 0 : index
    %40 = vector.load %arg5[%c100, %c0_6] : memref<128x256xf32, #tpu.memory_space<vmem>>, vector<28x256xf32>
    tpu.vector_store %arg5[%c100, %c0_6], %39 {strides = array<i32>} : memref<128x256xf32, #tpu.memory_space<vmem>>, vector<28x256xf32>,
    %41 = vector.extract_strided_slice %1 {offsets = [0, 0], sizes = [4, 256], strides = [1, 1]} : vector<4x324xf32> to vector<4x256xf32>
    %cst_7 = arith.constant 0.000000e+00 : f32
    %42 = vector.shape_cast %23 : vector<1x256xi1> to vector<1x256xi1>
    %43 = vector.broadcast %42 : vector<1x256xi1> to vector<4x256xi1>
    %44 = vector.broadcast %cst_7 : f32 to vector<4x256xf32>
    %45 = arith.select %43, %41, %44 : vector<4x256xi1>, vector<4x256xf32>
    %c0_8 = arith.constant 0 : index
    %c0_9 = arith.constant 0 : index
    %46 = vector.load %arg5[%c0_8, %c0_9] : memref<128x256xf32, #tpu.memory_space<vmem>>, vector<4x256xf32>
    tpu.vector_store %arg5[%c0_8, %c0_9], %45 {strides = array<i32>} : memref<128x256xf32, #tpu.memory_space<vmem>>, vector<4x256xf32>,
    %47 = vector.extract_strided_slice %1 {offsets = [0, 1], sizes = [4, 256], strides = [1, 1]} : vector<4x324xf32> to vector<4x256xf32>
    %cst_10 = arith.constant 0.000000e+00 : f32
    %48 = vector.shape_cast %28 : vector<1x256xi1> to vector<1x256xi1>
    %49 = vector.broadcast %48 : vector<1x256xi1> to vector<4x256xi1>
    %50 = vector.broadcast %cst_10 : f32 to vector<4x256xf32>
    %51 = arith.select %49, %47, %50 : vector<4x256xi1>, vector<4x256xf32>
    %c4 = arith.constant 4 : index
    %c0_11 = arith.constant 0 : index
    %52 = vector.load %arg5[%c4, %c0_11] : memref<128x256xf32, #tpu.memory_space<vmem>>, vector<4x256xf32>
    tpu.vector_store %arg5[%c4, %c0_11], %51 {strides = array<i32>} : memref<128x256xf32, #tpu.memory_space<vmem>>, vector<4x256xf32>,
    %53 = vector.extract_strided_slice %1 {offsets = [0, 2], sizes = [4, 256], strides = [1, 1]} : vector<4x324xf32> to vector<4x256xf32>
    %c8 = arith.constant 8 : index
    %c0_12 = arith.constant 0 : index
    %54 = vector.load %arg5[%c8, %c0_12] : memref<128x256xf32, #tpu.memory_space<vmem>>, vector<4x256xf32>
    tpu.vector_store %arg5[%c8, %c0_12], %53 {strides = array<i32>} : memref<128x256xf32, #tpu.memory_space<vmem>>, vector<4x256xf32>,
    %55 = vector.extract_strided_slice %1 {offsets = [0, 3], sizes = [4, 256], strides = [1, 1]} : vector<4x324xf32> to vector<4x256xf32>
    %cst_13 = arith.constant 0.000000e+00 : f32
    %56 = vector.shape_cast %33 : vector<1x256xi1> to vector<1x256xi1>
    %57 = vector.broadcast %56 : vector<1x256xi1> to vector<4x256xi1>
    %58 = vector.broadcast %cst_13 : f32 to vector<4x256xf32>
    %59 = arith.select %57, %55, %58 : vector<4x256xi1>, vector<4x256xf32>
    %c12 = arith.constant 12 : index
    %c0_14 = arith.constant 0 : index
    %60 = vector.load %arg5[%c12, %c0_14] : memref<128x256xf32, #tpu.memory_space<vmem>>, vector<4x256xf32>
    tpu.vector_store %arg5[%c12, %c0_14], %59 {strides = array<i32>} : memref<128x256xf32, #tpu.memory_space<vmem>>, vector<4x256xf32>,
    %61 = vector.extract_strided_slice %1 {offsets = [0, 4], sizes = [4, 256], strides = [1, 1]} : vector<4x324xf32> to vector<4x256xf32>
    %cst_15 = arith.constant 0.000000e+00 : f32
    %62 = vector.shape_cast %38 : vector<1x256xi1> to vector<1x256xi1>
    %63 = vector.broadcast %62 : vector<1x256xi1> to vector<4x256xi1>
    %64 = vector.broadcast %cst_15 : f32 to vector<4x256xf32>
    %65 = arith.select %63, %61, %64 : vector<4x256xi1>, vector<4x256xf32>
    %c16 = arith.constant 16 : index
    %c0_16 = arith.constant 0 : index
    %66 = vector.load %arg5[%c16, %c0_16] : memref<128x256xf32, #tpu.memory_space<vmem>>, vector<4x256xf32>
    tpu.vector_store %arg5[%c16, %c0_16], %65 {strides = array<i32>} : memref<128x256xf32, #tpu.memory_space<vmem>>, vector<4x256xf32>,
    %67 = vector.extract_strided_slice %1 {offsets = [0, 16], sizes = [4, 256], strides = [1, 1]} : vector<4x324xf32> to vector<4x256xf32>
    %cst_17 = arith.constant 0.000000e+00 : f32
    %68 = vector.shape_cast %23 : vector<1x256xi1> to vector<1x256xi1>
    %69 = vector.broadcast %68 : vector<1x256xi1> to vector<4x256xi1>
    %70 = vector.broadcast %cst_17 : f32 to vector<4x256xf32>
    %71 = arith.select %69, %67, %70 : vector<4x256xi1>, vector<4x256xf32>
    %c20 = arith.constant 20 : index
    %c0_18 = arith.constant 0 : index
    %72 = vector.load %arg5[%c20, %c0_18] : memref<128x256xf32, #tpu.memory_space<vmem>>, vector<4x256xf32>
    tpu.vector_store %arg5[%c20, %c0_18], %71 {strides = array<i32>} : memref<128x256xf32, #tpu.memory_space<vmem>>, vector<4x256xf32>,
    %73 = vector.extract_strided_slice %1 {offsets = [0, 17], sizes = [4, 256], strides = [1, 1]} : vector<4x324xf32> to vector<4x256xf32>
    %cst_19 = arith.constant 0.000000e+00 : f32
    %74 = vector.shape_cast %28 : vector<1x256xi1> to vector<1x256xi1>
    %75 = vector.broadcast %74 : vector<1x256xi1> to vector<4x256xi1>
    %76 = vector.broadcast %cst_19 : f32 to vector<4x256xf32>
    %77 = arith.select %75, %73, %76 : vector<4x256xi1>, vector<4x256xf32>
    %c24 = arith.constant 24 : index
    %c0_20 = arith.constant 0 : index
    %78 = vector.load %arg5[%c24, %c0_20] : memref<128x256xf32, #tpu.memory_space<vmem>>, vector<4x256xf32>
    tpu.vector_store %arg5[%c24, %c0_20], %77 {strides = array<i32>} : memref<128x256xf32, #tpu.memory_space<vmem>>, vector<4x256xf32>,
    %79 = vector.extract_strided_slice %1 {offsets = [0, 18], sizes = [4, 256], strides = [1, 1]} : vector<4x324xf32> to vector<4x256xf32>
    %c28 = arith.constant 28 : index
    %c0_21 = arith.constant 0 : index
    %80 = vector.load %arg5[%c28, %c0_21] : memref<128x256xf32, #tpu.memory_space<vmem>>, vector<4x256xf32>
    tpu.vector_store %arg5[%c28, %c0_21], %79 {strides = array<i32>} : memref<128x256xf32, #tpu.memory_space<vmem>>, vector<4x256xf32>,
    %81 = vector.extract_strided_slice %1 {offsets = [0, 19], sizes = [4, 256], strides = [1, 1]} : vector<4x324xf32> to vector<4x256xf32>
    %cst_22 = arith.constant 0.000000e+00 : f32
    %82 = vector.shape_cast %33 : vector<1x256xi1> to vector<1x256xi1>
    %83 = vector.broadcast %82 : vector<1x256xi1> to vector<4x256xi1>
    %84 = vector.broadcast %cst_22 : f32 to vector<4x256xf32>
    %85 = arith.select %83, %81, %84 : vector<4x256xi1>, vector<4x256xf32>
    %c32 = arith.constant 32 : index
    %c0_23 = arith.constant 0 : index
    %86 = vector.load %arg5[%c32, %c0_23] : memref<128x256xf32, #tpu.memory_space<vmem>>, vector<4x256xf32>
    tpu.vector_store %arg5[%c32, %c0_23], %85 {strides = array<i32>} : memref<128x256xf32, #tpu.memory_space<vmem>>, vector<4x256xf32>,
    %87 = vector.extract_strided_slice %1 {offsets = [0, 20], sizes = [4, 256], strides = [1, 1]} : vector<4x324xf32> to vector<4x256xf32>
    %cst_24 = arith.constant 0.000000e+00 : f32
    %88 = vector.shape_cast %38 : vector<1x256xi1> to vector<1x256xi1>
    %89 = vector.broadcast %88 : vector<1x256xi1> to vector<4x256xi1>
    %90 = vector.broadcast %cst_24 : f32 to vector<4x256xf32>
    %91 = arith.select %89, %87, %90 : vector<4x256xi1>, vector<4x256xf32>
    %c36 = arith.constant 36 : index
    %c0_25 = arith.constant 0 : index
    %92 = vector.load %arg5[%c36, %c0_25] : memref<128x256xf32, #tpu.memory_space<vmem>>, vector<4x256xf32>
    tpu.vector_store %arg5[%c36, %c0_25], %91 {strides = array<i32>} : memref<128x256xf32, #tpu.memory_space<vmem>>, vector<4x256xf32>,
    %93 = vector.extract_strided_slice %1 {offsets = [0, 32], sizes = [4, 256], strides = [1, 1]} : vector<4x324xf32> to vector<4x256xf32>
    %cst_26 = arith.constant 0.000000e+00 : f32
    %94 = vector.shape_cast %23 : vector<1x256xi1> to vector<1x256xi1>
    %95 = vector.broadcast %94 : vector<1x256xi1> to vector<4x256xi1>
    %96 = vector.broadcast %cst_26 : f32 to vector<4x256xf32>
    %97 = arith.select %95, %93, %96 : vector<4x256xi1>, vector<4x256xf32>
    %c40 = arith.constant 40 : index
    %c0_27 = arith.constant 0 : index
    %98 = vector.load %arg5[%c40, %c0_27] : memref<128x256xf32, #tpu.memory_space<vmem>>, vector<4x256xf32>
    tpu.vector_store %arg5[%c40, %c0_27], %97 {strides = array<i32>} : memref<128x256xf32, #tpu.memory_space<vmem>>, vector<4x256xf32>,
    %99 = vector.extract_strided_slice %1 {offsets = [0, 33], sizes = [4, 256], strides = [1, 1]} : vector<4x324xf32> to vector<4x256xf32>
    %cst_28 = arith.constant 0.000000e+00 : f32
    %100 = vector.shape_cast %28 : vector<1x256xi1> to vector<1x256xi1>
    %101 = vector.broadcast %100 : vector<1x256xi1> to vector<4x256xi1>
    %102 = vector.broadcast %cst_28 : f32 to vector<4x256xf32>
    %103 = arith.select %101, %99, %102 : vector<4x256xi1>, vector<4x256xf32>
    %c44 = arith.constant 44 : index
    %c0_29 = arith.constant 0 : index
    %104 = vector.load %arg5[%c44, %c0_29] : memref<128x256xf32, #tpu.memory_space<vmem>>, vector<4x256xf32>
    tpu.vector_store %arg5[%c44, %c0_29], %103 {strides = array<i32>} : memref<128x256xf32, #tpu.memory_space<vmem>>, vector<4x256xf32>,
    %105 = vector.extract_strided_slice %1 {offsets = [0, 34], sizes = [4, 256], strides = [1, 1]} : vector<4x324xf32> to vector<4x256xf32>
    %c48 = arith.constant 48 : index
    %c0_30 = arith.constant 0 : index
    %106 = vector.load %arg5[%c48, %c0_30] : memref<128x256xf32, #tpu.memory_space<vmem>>, vector<4x256xf32>
    tpu.vector_store %arg5[%c48, %c0_30], %105 {strides = array<i32>} : memref<128x256xf32, #tpu.memory_space<vmem>>, vector<4x256xf32>,
    %107 = vector.extract_strided_slice %1 {offsets = [0, 35], sizes = [4, 256], strides = [1, 1]} : vector<4x324xf32> to vector<4x256xf32>
    %cst_31 = arith.constant 0.000000e+00 : f32
    %108 = vector.shape_cast %33 : vector<1x256xi1> to vector<1x256xi1>
    %109 = vector.broadcast %108 : vector<1x256xi1> to vector<4x256xi1>
    %110 = vector.broadcast %cst_31 : f32 to vector<4x256xf32>
    %111 = arith.select %109, %107, %110 : vector<4x256xi1>, vector<4x256xf32>
    %c52 = arith.constant 52 : index
    %c0_32 = arith.constant 0 : index
    %112 = vector.load %arg5[%c52, %c0_32] : memref<128x256xf32, #tpu.memory_space<vmem>>, vector<4x256xf32>
    tpu.vector_store %arg5[%c52, %c0_32], %111 {strides = array<i32>} : memref<128x256xf32, #tpu.memory_space<vmem>>, vector<4x256xf32>,
    %113 = vector.extract_strided_slice %1 {offsets = [0, 36], sizes = [4, 256], strides = [1, 1]} : vector<4x324xf32> to vector<4x256xf32>
    %cst_33 = arith.constant 0.000000e+00 : f32
    %114 = vector.shape_cast %38 : vector<1x256xi1> to vector<1x256xi1>
    %115 = vector.broadcast %114 : vector<1x256xi1> to vector<4x256xi1>
    %116 = vector.broadcast %cst_33 : f32 to vector<4x256xf32>
    %117 = arith.select %115, %113, %116 : vector<4x256xi1>, vector<4x256xf32>
    %c56 = arith.constant 56 : index
    %c0_34 = arith.constant 0 : index
    %118 = vector.load %arg5[%c56, %c0_34] : memref<128x256xf32, #tpu.memory_space<vmem>>, vector<4x256xf32>
    tpu.vector_store %arg5[%c56, %c0_34], %117 {strides = array<i32>} : memref<128x256xf32, #tpu.memory_space<vmem>>, vector<4x256xf32>,
    %119 = vector.extract_strided_slice %1 {offsets = [0, 48], sizes = [4, 256], strides = [1, 1]} : vector<4x324xf32> to vector<4x256xf32>
    %cst_35 = arith.constant 0.000000e+00 : f32
    %120 = vector.shape_cast %23 : vector<1x256xi1> to vector<1x256xi1>
    %121 = vector.broadcast %120 : vector<1x256xi1> to vector<4x256xi1>
    %122 = vector.broadcast %cst_35 : f32 to vector<4x256xf32>
    %123 = arith.select %121, %119, %122 : vector<4x256xi1>, vector<4x256xf32>
    %c60 = arith.constant 60 : index
    %c0_36 = arith.constant 0 : index
    %124 = vector.load %arg5[%c60, %c0_36] : memref<128x256xf32, #tpu.memory_space<vmem>>, vector<4x256xf32>
    tpu.vector_store %arg5[%c60, %c0_36], %123 {strides = array<i32>} : memref<128x256xf32, #tpu.memory_space<vmem>>, vector<4x256xf32>,
    %125 = vector.extract_strided_slice %1 {offsets = [0, 49], sizes = [4, 256], strides = [1, 1]} : vector<4x324xf32> to vector<4x256xf32>
    %cst_37 = arith.constant 0.000000e+00 : f32
    %126 = vector.shape_cast %28 : vector<1x256xi1> to vector<1x256xi1>
    %127 = vector.broadcast %126 : vector<1x256xi1> to vector<4x256xi1>
    %128 = vector.broadcast %cst_37 : f32 to vector<4x256xf32>
    %129 = arith.select %127, %125, %128 : vector<4x256xi1>, vector<4x256xf32>
    %c64 = arith.constant 64 : index
    %c0_38 = arith.constant 0 : index
    %130 = vector.load %arg5[%c64, %c0_38] : memref<128x256xf32, #tpu.memory_space<vmem>>, vector<4x256xf32>
    tpu.vector_store %arg5[%c64, %c0_38], %129 {strides = array<i32>} : memref<128x256xf32, #tpu.memory_space<vmem>>, vector<4x256xf32>,
    %131 = vector.extract_strided_slice %1 {offsets = [0, 50], sizes = [4, 256], strides = [1, 1]} : vector<4x324xf32> to vector<4x256xf32>
    %c68 = arith.constant 68 : index
    %c0_39 = arith.constant 0 : index
    %132 = vector.load %arg5[%c68, %c0_39] : memref<128x256xf32, #tpu.memory_space<vmem>>, vector<4x256xf32>
    tpu.vector_store %arg5[%c68, %c0_39], %131 {strides = array<i32>} : memref<128x256xf32, #tpu.memory_space<vmem>>, vector<4x256xf32>,
    %133 = vector.extract_strided_slice %1 {offsets = [0, 51], sizes = [4, 256], strides = [1, 1]} : vector<4x324xf32> to vector<4x256xf32>
    %cst_40 = arith.constant 0.000000e+00 : f32
    %134 = vector.shape_cast %33 : vector<1x256xi1> to vector<1x256xi1>
    %135 = vector.broadcast %134 : vector<1x256xi1> to vector<4x256xi1>
    %136 = vector.broadcast %cst_40 : f32 to vector<4x256xf32>
    %137 = arith.select %135, %133, %136 : vector<4x256xi1>, vector<4x256xf32>
    %c72 = arith.constant 72 : index
    %c0_41 = arith.constant 0 : index
    %138 = vector.load %arg5[%c72, %c0_41] : memref<128x256xf32, #tpu.memory_space<vmem>>, vector<4x256xf32>
    tpu.vector_store %arg5[%c72, %c0_41], %137 {strides = array<i32>} : memref<128x256xf32, #tpu.memory_space<vmem>>, vector<4x256xf32>,
    %139 = vector.extract_strided_slice %1 {offsets = [0, 52], sizes = [4, 256], strides = [1, 1]} : vector<4x324xf32> to vector<4x256xf32>
    %cst_42 = arith.constant 0.000000e+00 : f32
    %140 = vector.shape_cast %38 : vector<1x256xi1> to vector<1x256xi1>
    %141 = vector.broadcast %140 : vector<1x256xi1> to vector<4x256xi1>
    %142 = vector.broadcast %cst_42 : f32 to vector<4x256xf32>
    %143 = arith.select %141, %139, %142 : vector<4x256xi1>, vector<4x256xf32>
    %c76 = arith.constant 76 : index
    %c0_43 = arith.constant 0 : index
    %144 = vector.load %arg5[%c76, %c0_43] : memref<128x256xf32, #tpu.memory_space<vmem>>, vector<4x256xf32>
    tpu.vector_store %arg5[%c76, %c0_43], %143 {strides = array<i32>} : memref<128x256xf32, #tpu.memory_space<vmem>>, vector<4x256xf32>,
    %145 = vector.extract_strided_slice %1 {offsets = [0, 64], sizes = [4, 256], strides = [1, 1]} : vector<4x324xf32> to vector<4x256xf32>
    %cst_44 = arith.constant 0.000000e+00 : f32
    %146 = vector.shape_cast %23 : vector<1x256xi1> to vector<1x256xi1>
    %147 = vector.broadcast %146 : vector<1x256xi1> to vector<4x256xi1>
    %148 = vector.broadcast %cst_44 : f32 to vector<4x256xf32>
    %149 = arith.select %147, %145, %148 : vector<4x256xi1>, vector<4x256xf32>
    %c80 = arith.constant 80 : index
    %c0_45 = arith.constant 0 : index
    %150 = vector.load %arg5[%c80, %c0_45] : memref<128x256xf32, #tpu.memory_space<vmem>>, vector<4x256xf32>
    tpu.vector_store %arg5[%c80, %c0_45], %149 {strides = array<i32>} : memref<128x256xf32, #tpu.memory_space<vmem>>, vector<4x256xf32>,
    %151 = vector.extract_strided_slice %1 {offsets = [0, 65], sizes = [4, 256], strides = [1, 1]} : vector<4x324xf32> to vector<4x256xf32>
    %cst_46 = arith.constant 0.000000e+00 : f32
    %152 = vector.shape_cast %28 : vector<1x256xi1> to vector<1x256xi1>
    %153 = vector.broadcast %152 : vector<1x256xi1> to vector<4x256xi1>
    %154 = vector.broadcast %cst_46 : f32 to vector<4x256xf32>
    %155 = arith.select %153, %151, %154 : vector<4x256xi1>, vector<4x256xf32>
    %c84 = arith.constant 84 : index
    %c0_47 = arith.constant 0 : index
    %156 = vector.load %arg5[%c84, %c0_47] : memref<128x256xf32, #tpu.memory_space<vmem>>, vector<4x256xf32>
    tpu.vector_store %arg5[%c84, %c0_47], %155 {strides = array<i32>} : memref<128x256xf32, #tpu.memory_space<vmem>>, vector<4x256xf32>,
    %157 = vector.extract_strided_slice %1 {offsets = [0, 66], sizes = [4, 256], strides = [1, 1]} : vector<4x324xf32> to vector<4x256xf32>
    %c88 = arith.constant 88 : index
    %c0_48 = arith.constant 0 : index
    %158 = vector.load %arg5[%c88, %c0_48] : memref<128x256xf32, #tpu.memory_space<vmem>>, vector<4x256xf32>
    tpu.vector_store %arg5[%c88, %c0_48], %157 {strides = array<i32>} : memref<128x256xf32, #tpu.memory_space<vmem>>, vector<4x256xf32>,
    %159 = vector.extract_strided_slice %1 {offsets = [0, 67], sizes = [4, 256], strides = [1, 1]} : vector<4x324xf32> to vector<4x256xf32>
    %cst_49 = arith.constant 0.000000e+00 : f32
    %160 = vector.shape_cast %33 : vector<1x256xi1> to vector<1x256xi1>
    %161 = vector.broadcast %160 : vector<1x256xi1> to vector<4x256xi1>
    %162 = vector.broadcast %cst_49 : f32 to vector<4x256xf32>
    %163 = arith.select %161, %159, %162 : vector<4x256xi1>, vector<4x256xf32>
    %c92 = arith.constant 92 : index
    %c0_50 = arith.constant 0 : index
    %164 = vector.load %arg5[%c92, %c0_50] : memref<128x256xf32, #tpu.memory_space<vmem>>, vector<4x256xf32>
    tpu.vector_store %arg5[%c92, %c0_50], %163 {strides = array<i32>} : memref<128x256xf32, #tpu.memory_space<vmem>>, vector<4x256xf32>,
    %165 = vector.extract_strided_slice %1 {offsets = [0, 68], sizes = [4, 256], strides = [1, 1]} : vector<4x324xf32> to vector<4x256xf32>
    %cst_51 = arith.constant 0.000000e+00 : f32
    %166 = vector.shape_cast %38 : vector<1x256xi1> to vector<1x256xi1>
    %167 = vector.broadcast %166 : vector<1x256xi1> to vector<4x256xi1>
    %168 = vector.broadcast %cst_51 : f32 to vector<4x256xf32>
    %169 = arith.select %167, %165, %168 : vector<4x256xi1>, vector<4x256xf32>
    %c96 = arith.constant 96 : index
    %c0_52 = arith.constant 0 : index
    %170 = vector.load %arg5[%c96, %c0_52] : memref<128x256xf32, #tpu.memory_space<vmem>>, vector<4x256xf32>
    tpu.vector_store %arg5[%c96, %c0_52], %169 {strides = array<i32>} : memref<128x256xf32, #tpu.memory_space<vmem>>, vector<4x256xf32>,
    %c0_53 = arith.constant 0 : index
    %c0_54 = arith.constant 0 : index
    %171 = vector.load %arg2[%c0_53, %c0_54] : memref<16x128xbf16, #tpu.memory_space<vmem>>, vector<16x128xbf16>
    %c0_55 = arith.constant 0 : index
    %c0_56 = arith.constant 0 : index
    %172 = vector.load %arg5[%c0_55, %c0_56] : memref<128x256xf32, #tpu.memory_space<vmem>>, vector<128x256xf32>
    %173 = arith.truncf %172 : vector<128x256xf32> to vector<128x256xbf16>
    %cst_57 = arith.constant dense<0.000000e+00> : vector<16x256xf32>
    %174 = tpu.matmul %171, %173, %cst_57 {dimension_numbers = #tpu.dot_dimension_numbers<[1], [0], [0], [1], [0, 0, 1, 1], [], []>} : vector<16x128xbf16>, vector<128x256xbf16>, vector<16x256xf32> -> vector<16x256xf32>
    %c0_58 = arith.constant 0 : index
    %c0_59 = arith.constant 0 : index
    %175 = vector.load %arg3[%c0_58, %c0_59] : memref<16x1xf32, #tpu.memory_space<vmem>>, vector<16x1xf32>
    %176 = vector.broadcast %175 : vector<16x1xf32> to vector<16x256xf32>
    %177 = arith.addf %174, %176 : vector<16x256xf32>
    %cst_60 = arith.constant 0.000000e+00 : f32
    %178 = vector.broadcast %cst_60 : f32 to vector<16x256xf32>
    %179 = arith.maximumf %177, %178 : vector<16x256xf32>
    %c0_61 = arith.constant 0 : index
    %c0_62 = arith.constant 0 : index
    %c0_63 = arith.constant 0 : index
    %180 = vector.load %arg4[%c0_61, %c0_62, %c0_63] : memref<1x16x256xf32, #tpu.memory_space<vmem>>, vector<1x16x256xf32>
    %181 = vector.shape_cast %180 : vector<1x16x256xf32> to vector<16x256xf32>
    %182 = vector.shape_cast %179 : vector<16x256xf32> to vector<1x16x256xf32>
    tpu.vector_store %arg4[%c0_61, %c0_62, %c0_63], %182 {strides = array<i32>} : memref<1x16x256xf32, #tpu.memory_space<vmem>>, vector<1x16x256xf32>,
    return
  }
  func.func @transform_0(%arg0: i32) -> (i32, i32, i32) {
    %c0_i32 = arith.constant 0 : i32
    %c0_i32_0 = arith.constant 0 : i32
    %c0_i32_1 = arith.constant 0 : i32
    return %arg0, %c0_i32, %c0_i32_0 : i32, i32, i32
  }
  func.func @transform_1(%arg0: i32) -> (i32, i32) {
    %c0_i32 = arith.constant 0 : i32
    %c0_i32_0 = arith.constant 0 : i32
    %c0_i32_1 = arith.constant 0 : i32
    return %c0_i32, %c0_i32_0 : i32, i32
  }
  func.func @transform_2(%arg0: i32) -> (i32, i32) {
    %c0_i32 = arith.constant 0 : i32
    %c0_i32_0 = arith.constant 0 : i32
    %c0_i32_1 = arith.constant 0 : i32
    return %c0_i32, %c0_i32_0 : i32, i32
  }
  func.func @transform_3(%arg0: i32) -> (i32, i32, i32) {
    %c0_i32 = arith.constant 0 : i32
    %c0_i32_0 = arith.constant 0 : i32
    %c0_i32_1 = arith.constant 0 : i32
    return %arg0, %c0_i32, %c0_i32_0 : i32, i32, i32
  }
}

</mosaic_0001>

<bundles_post_ra>
// kernel: inception_base.1
= control target key start
LH: loop header
LB: loop body
LE: loop exit
PB: predicated region body
PF: predicated region fallthrough
CT: control target
= control target key end

     0   :  { %s1082_s12 = smov 0   ;;  %s1350_s0 = inlined_call_operand.vmem [shape: f32[2,4,324], index: 0, kind: input, shape index: {}]   ;;  %s1351_s1 = inlined_call_operand.vmem [shape: bf16[16,128], index: 1, kind: input, shape index: {}]   ;;  %s1352_s2 = inlined_call_operand.vmem [shape: f32[16,1], index: 2, kind: input, shape index: {}]   ;;  %s1353_s3 = inlined_call_operand.vmem [shape: f32[2,16,256], index: 3, kind: output, shape index: {}]  }
   0x1 LB: > { %s974_s13 = sadd.s32 4294967295, %s1033_s12   ;;  %p978_p0 = scmp.ge.s32.totalorder %s1033_s12, 1  ;;  %s1033_s12 = sphi %s1082_s12, %s13_s12  }
   0x2   : > { %p137_p1 = scmp.lt.s32.totalorder %s1033_s12, 3 }
   0x4   : > { %p138_p2 = pnand %p978_p0, %p137_p1 }
   0x5   : > { %p161_p3 = scmp.lt.s32.totalorder (!%p138_p2), %s974_s13, 1  ;;  %s1035_s18 = smov (!%p138_p2), 127  }
   0x6   : > { %141 = sbr.rel (%p138_p2) target bundleno = 505 (0x1f9), region = 32  ;;  %s1036_s19 = smov (!%p138_p2), 126  }
   0x7   : > { %s1037_s20 = smov (!%p138_p2), 124   ;;  %s1038_s21 = smov (!%p138_p2), 112  }
   0x8   : > { %s1039_s22 = smov (!%p138_p2), 111   ;;  %s1040_s23 = smov (!%p138_p2), 109  }
   0x9   : > { %s1041_s24 = smov (!%p138_p2), 108   ;;  %s1042_s25 = smov (!%p138_p2), 96  }
   0xa   : > { %s1043_s26 = smov (!%p138_p2), 95   ;;  %s1044_s27 = smov (!%p138_p2), 94  }
   0xb   : > { %s1355_s13 = smov (!%p161_p3, %s974_s13), 1  ;;  %s1045_s28 = smov 93   ;;  %v173_v41 = vlaneseq  ;;  %vm263_vm2 = vcmask 1039360   ;;  %vm344_vm5 = vcmask 1014784   ;;  %vm365_vm8 = vcmask 916480  }
   0xc   : > { %s990_s14 = smul.u32 12, %s1355_s13  ;;  %s1046_s29 = smov 92   ;;  %vm433_vm10 = vcmask 891904   ;;  %vm454_vm11 = vcmask 883712   ;;  %vm481_vm13 = vcmask 785408   ;;  %vm502_vm14 = vcmask 777216  }
   0xd   : > { %v174_v45 = vand.u32 127, %v173_v41  ;;  %s1047_s30 = smov 80   ;;  %s1048_s4 = smov 79   ;;  %vm529_vm15 = vcmask 769024  }
   0xe   : > { %s165_s17 = scalar_lea.vmem %s1350_s0, %s990_s14  ;;  %s1049_s5 = smov 78  }
   0xf   : > { %v1096_v0 = vld [vmem:[%s165_s17] sm:$0xff]  ;;  %v1098_v1 = vld [vmem:[%s165_s17 + $0x8] sm:$0xf]  ;;  %v175_v46 = vadd.s32 128, %v174_v45  ;;  %v1156_v47 = vand.u32 15, %v174_v45  ;;  %s1050_s6 = smov 77  }
  0x10   : > { %237 = vst [vmem:[#allocation1] ss:$2 sm:$0xff] %v1096_v0  ;;  %s1051_s7 = smov 76   ;;  %s1052_s8 = smov 64  }
  0x11   : > { %253 = vst [vmem:[#allocation1 + $0x10] ss:$2 sm:$0xff] %v1098_v1  ;;  %vm200_vm0 = vcmp.ge.s32.totalorder %v1156_v47, 2  ;;  %v1161_v51 = vand.u32 15, %v175_v46  ;;  %vm206_vm3 = vcmp.ge.s32.totalorder %v1156_v47, 1  ;;  %vm220_vm7 = vcmp.lt.s32.totalorder %v1156_v47, 14 }
  0x12   : > { %s1053_s9 = smov 63   ;;  %s1054_s10 = smov 62   ;;  %vm214_vm12 = vcmp.lt.s32.totalorder %v1156_v47, 15 }
  0x13   : > { %vm201_vm1 = vcmp.ge.s32.totalorder %v1161_v51, 2  ;;  %vm207_vm4 = vcmp.ge.s32.totalorder %v1161_v51, 1  ;;  %vm221_vm6 = vcmp.lt.s32.totalorder %v1161_v51, 14  ;;  %vm215_vm9 = vcmp.lt.s32.totalorder %v1161_v51, 15  ;;  %s1055_s11 = smov 61   ;;  %s1056_s14 = smov 60  }
  0x14   : > { %s1057_s15 = smov 110   ;;  %s1058_s16 = smov 125  }
  0x17   : > { %v1102_v2 = vld.sshfl [vmem:[#allocation1] sm:$0xff pattern:$0x75316420]  ;;  %v1104_v3 = vld.sshfl [vmem:[#allocation1 + $0x8] sm:$0xff pattern:$0x75316420] }
  0x18   : > { %251 = vst [vmem:[#allocation1] ss:$2 sm:$0xff] %v1096_v0  ;;  %v256_v4 = vld.sshfl [vmem:[#allocation1 + $0x10] sm:$0xff pattern:$0x75316420]  ;;  %v242_v52 = vsel %vm200_vm0, %v1102_v2, 0.0 }
  0x19   : > { %261 = vrot.lane.b32.xlu1 %v256_v4, %s1035_s18  ;;  %280 = vst [vmem:[#allocation1 + $0x10] ss:$2 sm:$0xff] %v1098_v1  ;;  %v243_v53 = vsel %vm201_vm1, %v1104_v3, 0.0 }
  0x1a   : > { %244 = vst [vmem:[#allocation2 + $0x40] sm:$0xf] %v242_v52 }
  0x1b   : > { %245 = vst [vmem:[#allocation2 + $0x48] sm:$0xf] %v243_v53 }
  0x1f   : > { %v254_v5 = vld.sshfl [vmem:[#allocation1] sm:$0xff pattern:$0x75316420]  ;;  %v255_v6 = vld.sshfl [vmem:[#allocation1 + $0x8] sm:$0xff pattern:$0x75316420] }
  0x20   : > { %257 = vrot.lane.b32.xlu0 %v254_v5, %s1035_s18  ;;  %278 = vst [vmem:[#allocation1] ss:$2 sm:$0xff] %v1096_v0  ;;  %v1109_v7 = vld.sshfl [vmem:[#allocation1 + $0x10] sm:$0xff pattern:$0x75316420] }
  0x21   : > { %303 = vst [vmem:[#allocation1 + $0x10] ss:$2 sm:$0xff] %v1098_v1 }
  0x27   : > { %v281_v8 = vld.sshfl [vmem:[#allocation1] sm:$0xff pattern:$0x75316420]  ;;  %v1112_v9 = vld.sshfl [vmem:[#allocation1 + $0x8] sm:$0xff pattern:$0x75316420] }
  0x28   : > { %259 = vrot.lane.b32.xlu0 %v255_v6, %s1035_s18  ;;  %v1114_v10 = vld.sshfl [vmem:[#allocation1 + $0x10] sm:$0xff pattern:$0x75316420]  ;;  %284 = vrot.lane.b32.xlu1 %v281_v8, %s1036_s19  ;;  %301 = vst [vmem:[#allocation1] ss:$2 sm:$0xff] %v1096_v0 }
  0x29   : > { %334 = vst [vmem:[#allocation1 + $0x10] ss:$2 sm:$0xff] %v1098_v1 }
  0x2f   : > { %v1119_v11 = vld.sshfl [vmem:[#allocation1] sm:$0xff pattern:$0x75316420]  ;;  %v1121_v12 = vld.sshfl [vmem:[#allocation1 + $0x8] sm:$0xff pattern:$0x75316420] }
  0x30   : > { %v337_v13 = vld.sshfl [vmem:[#allocation1 + $0x10] sm:$0xff pattern:$0x75316420]  ;;  %332 = vst [vmem:[#allocation1] ss:$2 sm:$0xff] %v1096_v0 }
  0x31   : > { %342 = vrot.lane.b32.xlu0 %v337_v13, %s1037_s20  ;;  %355 = vst [vmem:[#allocation1 + $0x10] ss:$2 sm:$0xff] %v1098_v1 }
  0x37   : > { %v335_v14 = vld.sshfl [vmem:[#allocation1] sm:$0xff pattern:$0x75316420]  ;;  %v336_v15 = vld.sshfl [vmem:[#allocation1 + $0x8] sm:$0xff pattern:$0x75316420] }
  0x38   : > { %v358_v16 = vld.sshfl [vmem:[#allocation1 + $0x10] sm:$0xff pattern:$0x75316420]  ;;  %338 = vrot.lane.b32.xlu1 %v335_v14, %s1037_s20  ;;  %353 = vst [vmem:[#allocation1] ss:$2 sm:$0xff] %v1096_v0  ;;  %340 = vrot.lane.b32.xlu2 %v336_v15, %s1037_s20 }
  0x39   : > { %363 = vrot.lane.b32.xlu0 %v358_v16, %s1038_s21  ;;  %382 = vst [vmem:[#allocation1 + $0x10] ss:$2 sm:$0xff] %v1098_v1 }
  0x3f   : > { %v356_v17 = vld.sshfl [vmem:[#allocation1] sm:$0xff pattern:$0x75316420]  ;;  %v357_v18 = vld.sshfl [vmem:[#allocation1 + $0x8] sm:$0xff pattern:$0x75316420] }
  0x40   : > { %359 = vrot.lane.b32.xlu1 %v356_v17, %s1038_s21  ;;  %v1127_v19 = vld.sshfl [vmem:[#allocation1 + $0x10] sm:$0xff pattern:$0x75316420]  ;;  %361 = vrot.lane.b32.xlu2 %v357_v18, %s1038_s21  ;;  %380 = vst [vmem:[#allocation1] ss:$2 sm:$0xff] %v1096_v0 }
  0x41   : > { %404 = vst [vmem:[#allocation1 + $0x11] ss:$2 sm:$0xff] %v1098_v1 }
  0x47   : > { %v383_v20 = vld.sshfl [vmem:[#allocation1] sm:$0xff pattern:$0x75316420]  ;;  %v1131_v21 = vld.sshfl [vmem:[#allocation1 + $0x8] sm:$0xff pattern:$0x75316420] }
  0x48   : > { %v1133_v22 = vld.sshfl [vmem:[#allocation1 + $0x10] sm:$0xff pattern:$0x75316420]  ;;  %386 = vrot.lane.b32.xlu1 %v383_v20, %s1039_s22  ;;  %402 = vst [vmem:[#allocation1 + $0x1] ss:$2 sm:$0xff] %v1096_v0 }
  0x49   : > { %423 = vst [vmem:[#allocation1 + $0x10] ss:$2 sm:$0xff] %v1098_v1 }
  0x4f   : > { %v1138_v23 = vld.sshfl [vmem:[#allocation1] sm:$0xff pattern:$0x75316420]  ;;  %v1140_v24 = vld.sshfl [vmem:[#allocation1 + $0x8] sm:$0xff pattern:$0x75316420] }
  0x50   : > { %v426_v25 = vld.sshfl [vmem:[#allocation1 + $0x10] sm:$0xff pattern:$0x75316420]  ;;  %421 = vst [vmem:[#allocation1] ss:$2 sm:$0xff] %v1096_v0 }
  0x51   : > { %431 = vrot.lane.b32.xlu0 %v426_v25, %s1040_s23  ;;  %444 = vst [vmem:[#allocation1 + $0x10] ss:$2 sm:$0xff] %v1098_v1 }
  0x57   : > { %v425_v26 = vld.sshfl [vmem:[#allocation1 + $0x8] sm:$0xff pattern:$0x75316420]  ;;  %v424_v27 = vld.sshfl [vmem:[#allocation1] sm:$0xff pattern:$0x75316420] }
  0x58   : > { %v447_v28 = vld.sshfl [vmem:[#allocation1 + $0x10] sm:$0xff pattern:$0x75316420]  ;;  %429 = vrot.lane.b32.xlu2 %v425_v26, %s1040_s23  ;;  %427 = vrot.lane.b32.xlu1 %v424_v27, %s1040_s23  ;;  %442 = vst [vmem:[#allocation1] ss:$2 sm:$0xff] %v1096_v0  ;;  %s988_s23 = sshll.u32 %s1355_s13, 5 }
  0x59   : > { %452 = vrot.lane.b32.xlu0 %v447_v28, %s1041_s24  ;;  %471 = vst [vmem:[#allocation1 + $0x10] ss:$2 sm:$0xff] %v1098_v1 }
  0x5f   : > { %v446_v29 = vld.sshfl [vmem:[#allocation1 + $0x8] sm:$0xff pattern:$0x75316420]  ;;  %v445_v30 = vld.sshfl [vmem:[#allocation1] sm:$0xff pattern:$0x75316420] }
  0x60   : > { %v474_v31 = vld.sshfl [vmem:[#allocation1 + $0x10] sm:$0xff pattern:$0x75316420]  ;;  %450 = vrot.lane.b32.xlu2 %v446_v29, %s1041_s24  ;;  %448 = vrot.lane.b32.xlu1 %v445_v30, %s1041_s24  ;;  %469 = vst [vmem:[#allocation1] ss:$2 sm:$0xff] %v1096_v0 }
  0x61   : > { %479 = vrot.lane.b32.xlu0 %v474_v31, %s1042_s25  ;;  %492 = vst [vmem:[#allocation1 + $0x10] ss:$2 sm:$0xff] %v1098_v1 }
  0x67   : > { %v473_v32 = vld.sshfl [vmem:[#allocation1 + $0x8] sm:$0xff pattern:$0x75316420]  ;;  %v472_v33 = vld.sshfl [vmem:[#allocation1] sm:$0xff pattern:$0x75316420] }
  0x68   : > { %v495_v34 = vld.sshfl [vmem:[#allocation1 + $0x10] sm:$0xff pattern:$0x75316420]  ;;  %477 = vrot.lane.b32.xlu2 %v473_v32, %s1042_s25  ;;  %475 = vrot.lane.b32.xlu1 %v472_v33, %s1042_s25  ;;  %490 = vst [vmem:[#allocation1] ss:$2 sm:$0xff] %v1096_v0 }
  0x69   : > { %500 = vrot.lane.b32.xlu0 %v495_v34, %s1043_s26  ;;  %519 = vst [vmem:[#allocation1 + $0x10] ss:$2 sm:$0xff] %v1098_v1 }
  0x6f   : > { %v494_v35 = vld.sshfl [vmem:[#allocation1 + $0x8] sm:$0xff pattern:$0x75316420]  ;;  %v493_v36 = vld.sshfl [vmem:[#allocation1] sm:$0xff pattern:$0x75316420] }
  0x70   : > { %v522_v37 = vld.sshfl [vmem:[#allocation1 + $0x10] sm:$0xff pattern:$0x75316420]  ;;  %498 = vrot.lane.b32.xlu2 %v494_v35, %s1043_s26  ;;  %496 = vrot.lane.b32.xlu1 %v493_v36, %s1043_s26  ;;  %517 = vst [vmem:[#allocation1] ss:$2 sm:$0xff] %v1096_v0  ;;  %s170_s26 = scalar_lea.vmem %s1353_s3, %s988_s23 }
  0x71   : > { %527 = vrot.lane.b32.xlu0 %v522_v37, %s1044_s27  ;;  %538 = vst [vmem:[#allocation1 + $0x10] ss:$2 sm:$0xff] %v1098_v1 }
  0x77   : > { %v521_v38 = vld.sshfl [vmem:[#allocation1 + $0x8] sm:$0xff pattern:$0x75316420]  ;;  %v520_v39 = vld.sshfl [vmem:[#allocation1] sm:$0xff pattern:$0x75316420] }
  0x78   : > { %v541_v40 = vld.sshfl [vmem:[#allocation1 + $0x10] sm:$0xff pattern:$0x75316420]  ;;  %525 = vrot.lane.b32.xlu2 %v521_v38, %s1044_s27  ;;  %523 = vrot.lane.b32.xlu1 %v520_v39, %s1044_s27  ;;  %536 = vst [vmem:[#allocation1] ss:$2 sm:$0xff] %v1096_v0 }
  0x79   : > { %546 = vrot.lane.b32.xlu0 %v541_v40, %s1045_s28  ;;  %565 = vst [vmem:[#allocation1 + $0x10] ss:$2 sm:$0xff] %v1098_v1 }
  0x7f   : > { %v540_v42 = vld.sshfl [vmem:[#allocation1 + $0x8] sm:$0xff pattern:$0x75316420]  ;;  %v539_v43 = vld.sshfl [vmem:[#allocation1] sm:$0xff pattern:$0x75316420] }
  0x80   : > { %v568_v44 = vld.sshfl [vmem:[#allocation1 + $0x10] sm:$0xff pattern:$0x75316420]  ;;  %544 = vrot.lane.b32.xlu2 %v540_v42, %s1045_s28  ;;  %542 = vrot.lane.b32.xlu1 %v539_v43, %s1045_s28  ;;  %563 = vst [vmem:[#allocation1] ss:$2 sm:$0xff] %v1096_v0 }
  0x81   : > { %573 = vrot.lane.b32.xlu0 %v568_v44, %s1046_s29  ;;  %586 = vst [vmem:[#allocation1 + $0x10] ss:$2 sm:$0xff] %v1098_v1 }
  0x87   : > { %v567_v48 = vld.sshfl [vmem:[#allocation1 + $0x8] sm:$0xff pattern:$0x75316420]  ;;  %v566_v49 = vld.sshfl [vmem:[#allocation1] sm:$0xff pattern:$0x75316420] }
  0x88   : > { %v589_v50 = vld.sshfl [vmem:[#allocation1 + $0x10] sm:$0xff pattern:$0x75316420]  ;;  %571 = vrot.lane.b32.xlu2 %v567_v48, %s1046_s29  ;;  %569 = vrot.lane.b32.xlu1 %v566_v49, %s1046_s29  ;;  %584 = vst [vmem:[#allocation1] ss:$2 sm:$0xff] %v1096_v0 }
  0x89   : > { %594 = vrot.lane.b32.xlu0 %v589_v50, %s1047_s30  ;;  %613 = vst [vmem:[#allocation1 + $0x10] ss:$2 sm:$0xff] %v1098_v1 }
  0x8b   : > { %v262_v58 = vpop.permute.xlu1 %261 }
  0x8f   : > { %v588_v54 = vld.sshfl [vmem:[#allocation1 + $0x8] sm:$0xff pattern:$0x75316420]  ;;  %v587_v55 = vld.sshfl [vmem:[#allocation1] sm:$0xff pattern:$0x75316420] }
  0x90   : > { %v616_v56 = vld.sshfl [vmem:[#allocation1 + $0x10] sm:$0xff pattern:$0x75316420]  ;;  %592 = vrot.lane.b32.xlu2 %v588_v54, %s1047_s30  ;;  %590 = vrot.lane.b32.xlu1 %v587_v55, %s1047_s30  ;;  %611 = vst [vmem:[#allocation1] ss:$2 sm:$0xff] %v1096_v0 }
  0x91   : > { %621 = vrot.lane.b32.xlu0 %v616_v56, %s1048_s4  ;;  %635 = vst [vmem:[#allocation1 + $0x11] ss:$2 sm:$0xff] %v1098_v1 }
  0x92   : > { %v258_v57 = vpop.permute.xlu0 %257  ;;  %v341_v8 = vpop.permute.xlu2 %340 }
  0x97   : > { %v615_v59 = vld.sshfl [vmem:[#allocation1 + $0x8] sm:$0xff pattern:$0x75316420]  ;;  %v614_v60 = vld.sshfl [vmem:[#allocation1] sm:$0xff pattern:$0x75316420] }
  0x98   : > { %v638_v61 = vld.sshfl [vmem:[#allocation1 + $0x10] sm:$0xff pattern:$0x75316420]  ;;  %619 = vrot.lane.b32.xlu2 %v615_v59, %s1048_s4  ;;  %617 = vrot.lane.b32.xlu1 %v614_v60, %s1048_s4  ;;  %633 = vst [vmem:[#allocation1 + $0x1] ss:$2 sm:$0xff] %v1096_v0 }
  0x99   : > { %643 = vrot.lane.b32.xlu0 %v638_v61, %s1049_s5  ;;  %654 = vst [vmem:[#allocation1 + $0x10] ss:$2 sm:$0xff] %v1098_v1 }
  0x9a   : > { %v260_v62 = vpop.permute.xlu0 %259  ;;  %v1180_v15 = vpop.permute.xlu1 %284 }
  0x9b   : > { %v264_v63 = vsel %vm263_vm2, %v258_v57, %v260_v62  ;;  %v265_v2 = vsel %vm263_vm2, %v260_v62, %v262_v58  ;;  %v362_v26 = vpop.permute.xlu2 %361  ;;  %vm548_vm2 = vcmask 760832  }
  0x9c   : > { %v268_v3 = vsel %vm206_vm3, %v264_v63, 0.0  ;;  %v269_v4 = vsel %vm207_vm4, %v265_v2, 0.0 }
  0x9d   : > { %v272_v5 = vrot.slane %v268_v3, 4  ;;  %v273_v6 = vrot.slane %v269_v4, 4 }
  0x9f   : > { %276 = vst [vmem:[#allocation2 + $0x40] sm:$0xf0] %v272_v5  ;;  %v637_v13 = vld.sshfl [vmem:[#allocation1 + $0x8] sm:$0xff pattern:$0x75316420] }
  0xa0   : > { %277 = vst [vmem:[#allocation2 + $0x48] sm:$0xf0] %v273_v6  ;;  %v657_v14 = vld.sshfl [vmem:[#allocation1 + $0x10] sm:$0xff pattern:$0x75316420]  ;;  %641 = vrot.lane.b32.xlu2 %v637_v13, %s1049_s5 }
  0xa1   : > { %662 = vrot.lane.b32.xlu0 %v657_v14, %s1050_s6  ;;  %675 = vst [vmem:[#allocation1 + $0x10] ss:$2 sm:$0xff] %v1098_v1  ;;  %v636_v16 = vld.sshfl [vmem:[#allocation1] sm:$0xff pattern:$0x75316420] }
  0xa2   : > { %639 = vrot.lane.b32.xlu1 %v636_v16, %s1049_s5  ;;  %652 = vst [vmem:[#allocation1] ss:$2 sm:$0xff] %v1096_v0 }
  0xa3   : > { %v343_v17 = vpop.permute.xlu0 %342 }
  0xa4   : > { %v346_v18 = vsel %vm344_vm5, %v341_v8, %v343_v17 }
  0xa5   : > { %v350_v20 = vsel %vm221_vm6, %v346_v18, 0.0 }
  0xa6   : > { %352 = vst [vmem:[#allocation2 + $0xb0] sm:$0xf] %v350_v20 }
  0xa8   : > { %v678_v25 = vld.sshfl [vmem:[#allocation1 + $0x10] sm:$0xff pattern:$0x75316420] }
  0xa9   : > { %683 = vrot.lane.b32.xlu0 %v678_v25, %s1051_s7  ;;  %702 = vst [vmem:[#allocation1 + $0x10] ss:$2 sm:$0xff] %v1098_v1  ;;  %v656_v27 = vld.sshfl [vmem:[#allocation1 + $0x8] sm:$0xff pattern:$0x75316420] }
  0xaa   : > { %660 = vrot.lane.b32.xlu2 %v656_v27, %s1050_s6  ;;  %v655_v28 = vld.sshfl [vmem:[#allocation1] sm:$0xff pattern:$0x75316420]  ;;  %v339_v29 = vpop.permute.xlu1 %338 }
  0xab   : > { %658 = vrot.lane.b32.xlu1 %v655_v28, %s1050_s6  ;;  %673 = vst [vmem:[#allocation1] ss:$2 sm:$0xff] %v1096_v0  ;;  %v364_v30 = vpop.permute.xlu0 %363  ;;  %v345_v31 = vsel %vm344_vm5, %v339_v29, %v341_v8  ;;  %vm575_vm5 = vcmask 752640  }
  0xac   : > { %v349_v32 = vsel %vm220_vm7, %v345_v31, 0.0  ;;  %v367_v33 = vsel %vm365_vm8, %v362_v26, %v364_v30 }
  0xad   : > { %351 = vst [vmem:[#allocation2 + $0x20] sm:$0xf] %v349_v32  ;;  %v371_v34 = vsel %vm201_vm1, %v367_v33, 0.0 }
  0xae   : > { %v375_v35 = vrot.slane %v371_v34, 4 }
  0xb0   : > { %379 = vst [vmem:[#allocation2 + $0xb0] sm:$0xf0] %v375_v35  ;;  %v705_v36 = vld.sshfl [vmem:[#allocation1 + $0x10] sm:$0xff pattern:$0x75316420] }
  0xb1   : > { %710 = vrot.lane.b32.xlu0 %v705_v36, %s1052_s8  ;;  %723 = vst [vmem:[#allocation1 + $0x10] ss:$2 sm:$0xff] %v1098_v1 }
  0xb2   : > { %v677_v37 = vld.sshfl [vmem:[#allocation1 + $0x8] sm:$0xff pattern:$0x75316420]  ;;  %v676_v38 = vld.sshfl [vmem:[#allocation1] sm:$0xff pattern:$0x75316420]  ;;  %v360_v39 = vpop.permute.xlu1 %359  ;;  %v430_v40 = vpop.permute.xlu2 %429 }
  0xb3   : > { %681 = vrot.lane.b32.xlu2 %v677_v37, %s1051_s7  ;;  %679 = vrot.lane.b32.xlu1 %v676_v38, %s1051_s7  ;;  %700 = vst [vmem:[#allocation1] ss:$2 sm:$0xff] %v1096_v0  ;;  %v366_v41 = vsel %vm365_vm8, %v360_v39, %v362_v26  ;;  %vm596_vm8 = vcmask 654336  }
  0xb4   : > { %v370_v42 = vsel %vm200_vm0, %v366_v41, 0.0 }
  0xb5   : > { %v374_v43 = vrot.slane %v370_v42, 4 }
  0xb7   : > { %378 = vst [vmem:[#allocation2 + $0x20] sm:$0xf0] %v374_v43 }
  0xb8   : > { %v726_v44 = vld.sshfl [vmem:[#allocation1 + $0x10] sm:$0xff pattern:$0x75316420] }
  0xb9   : > { %731 = vrot.lane.b32.xlu0 %v726_v44, %s1053_s9  ;;  %750 = vst [vmem:[#allocation1 + $0x10] ss:$2 sm:$0xff] %v1098_v1 }
  0xba   : > { %v704_v45 = vld.sshfl [vmem:[#allocation1 + $0x8] sm:$0xff pattern:$0x75316420]  ;;  %v703_v46 = vld.sshfl [vmem:[#allocation1] sm:$0xff pattern:$0x75316420]  ;;  %v451_v48 = vpop.permute.xlu2 %450  ;;  %v1204_v50 = vpop.permute.xlu1 %386 }
  0xbb   : > { %708 = vrot.lane.b32.xlu2 %v704_v45, %s1052_s8  ;;  %706 = vrot.lane.b32.xlu1 %v703_v46, %s1052_s8  ;;  %721 = vst [vmem:[#allocation1] ss:$2 sm:$0xff] %v1096_v0 }
  0xc0   : > { %v753_v49 = vld.sshfl [vmem:[#allocation1 + $0x10] sm:$0xff pattern:$0x75316420] }
  0xc1   : > { %758 = vrot.lane.b32.xlu0 %v753_v49, %s1054_s10  ;;  %769 = vst [vmem:[#allocation1 + $0x10] ss:$2 sm:$0xff] %v1098_v1 }
  0xc2   : > { %v725_v52 = vld.sshfl [vmem:[#allocation1 + $0x8] sm:$0xff pattern:$0x75316420]  ;;  %v724_v53 = vld.sshfl [vmem:[#allocation1] sm:$0xff pattern:$0x75316420]  ;;  %v478_v54 = vpop.permute.xlu2 %477 }
  0xc3   : > { %729 = vrot.lane.b32.xlu2 %v725_v52, %s1053_s9  ;;  %727 = vrot.lane.b32.xlu1 %v724_v53, %s1053_s9  ;;  %748 = vst [vmem:[#allocation1] ss:$2 sm:$0xff] %v1096_v0  ;;  %v432_v55 = vpop.permute.xlu0 %431 }
  0xc4   : > { %v435_v56 = vsel %vm433_vm10, %v430_v40, %v432_v55 }
  0xc5   : > { %v439_v57 = vsel %vm215_vm9, %v435_v56, 0.0 }
  0xc6   : > { %441 = vst [vmem:[#allocation2 + $0x18] sm:$0xf] %v439_v57 }
  0xc8   : > { %v772_v58 = vld.sshfl [vmem:[#allocation1 + $0x10] sm:$0xff pattern:$0x75316420] }
  0xc9   : > { %777 = vrot.lane.b32.xlu0 %v772_v58, %s1055_s11  ;;  %796 = vst [vmem:[#allocation1 + $0x10] ss:$2 sm:$0xff] %v1098_v1 }
  0xca   : > { %v752_v59 = vld.sshfl [vmem:[#allocation1 + $0x8] sm:$0xff pattern:$0x75316420]  ;;  %v751_v60 = vld.sshfl [vmem:[#allocation1] sm:$0xff pattern:$0x75316420]  ;;  %v428_v61 = vpop.permute.xlu1 %427  ;;  %v499_v62 = vpop.permute.xlu2 %498 }
  0xcb   : > { %756 = vrot.lane.b32.xlu2 %v752_v59, %s1054_s10  ;;  %754 = vrot.lane.b32.xlu1 %v751_v60, %s1054_s10  ;;  %767 = vst [vmem:[#allocation1] ss:$2 sm:$0xff] %v1096_v0  ;;  %v453_v63 = vpop.permute.xlu0 %452  ;;  %v434_v2 = vsel %vm433_vm10, %v428_v61, %v430_v40  ;;  %vm623_vm10 = vcmask 646144  }
  0xcc   : > { %v456_v3 = vsel %vm454_vm11, %v451_v48, %v453_v63  ;;  %v438_v4 = vsel %vm214_vm12, %v434_v2, 0.0 }
  0xcd   : > { %v460_v1 = vsel %vm221_vm6, %v456_v3, 0.0  ;;  %440 = vst [vmem:[#allocation2 + $0xf8] sm:$0xf] %v438_v4 }
  0xce   : > { %v464_v5 = vrot.slane %v460_v1, 4 }
  0xd0   : > { %468 = vst [vmem:[#allocation2 + $0x18] sm:$0xf0] %v464_v5  ;;  %v799_v6 = vld.sshfl [vmem:[#allocation1 + $0x10] sm:$0xff pattern:$0x75316420] }
  0xd1   : > { %804 = vrot.lane.b32.xlu0 %v799_v6, %s1056_s14 }
  0xd2   : > { %v771_v8 = vld.sshfl [vmem:[#allocation1 + $0x8] sm:$0xff pattern:$0x75316420]  ;;  %v770_v13 = vld.sshfl [vmem:[#allocation1] sm:$0xff pattern:$0x75316420]  ;;  %v449_v14 = vpop.permute.xlu1 %448  ;;  %v526_v16 = vpop.permute.xlu2 %525 }
  0xd3   : > { %775 = vrot.lane.b32.xlu2 %v771_v8, %s1055_s11  ;;  %773 = vrot.lane.b32.xlu1 %v770_v13, %s1055_s11  ;;  %794 = vst [vmem:[#allocation1] ss:$2 sm:$0xff] %v1096_v0  ;;  %v480_v17 = vpop.permute.xlu0 %479  ;;  %v455_v18 = vsel %vm454_vm11, %v449_v14, %v451_v48  ;;  %vm645_vm11 = vcmask 637952  }
  0xd4   : > { %v483_v20 = vsel %vm481_vm13, %v478_v54, %v480_v17  ;;  %v459_v25 = vsel %vm220_vm7, %v455_v18, 0.0 }
  0xd5   : > { %v487_v26 = vsel %vm201_vm1, %v483_v20, 0.0  ;;  %v463_v27 = vrot.slane %v459_v25, 4 }
  0xd6   : > { %489 = vst [vmem:[#allocation2 + $0x88] sm:$0xf] %v487_v26 }
  0xd7   : > { %467 = vst [vmem:[#allocation2 + $0xf8] sm:$0xf0] %v463_v27  ;;  %v826_v47 = vld [vmem:[#allocation2 + $0x18] sm:$0xff] }
  0xd9   : > { %390 = vrot.lane.b32.xlu0 %v1127_v19, %s1039_s22 }
  0xda   : > { %v797_v28 = vld.sshfl [vmem:[#allocation1] sm:$0xff pattern:$0x75316420]  ;;  %v476_v0 = vpop.permute.xlu1 %475  ;;  %v545_v29 = vpop.permute.xlu2 %544  ;;  %v798_v35 = vld.sshfl [vmem:[#allocation1 + $0x8] sm:$0xff pattern:$0x75316420] }
  0xdb   : > { %408 = vrot.lane.b32.xlu1 %v1138_v23, %s1057_s15  ;;  %800 = vrot.lane.b32.xlu2 %v797_v28, %s1056_s14  ;;  %v501_v30 = vpop.permute.xlu0 %500  ;;  %v482_v31 = vsel %vm481_vm13, %v476_v0, %v478_v54  ;;  %vm664_vm13 = vcmask 629760  }
  0xdc   : > { %v504_v32 = vsel %vm502_vm14, %v499_v62, %v501_v30  ;;  %v486_v33 = vsel %vm200_vm0, %v482_v31, 0.0 }
  0xdd   : > { %v508_v19 = vsel %vm207_vm4, %v504_v32, 0.0  ;;  %488 = vst [vmem:[#allocation2] sm:$0xf] %v486_v33 }
  0xde   : > { %v512_v34 = vrot.slane %v508_v19, 4 }
  0xe0   : > { %516 = vst [vmem:[#allocation2 + $0x88] sm:$0xf0] %v512_v34 }
  0xe1   : > { %412 = vrot.lane.b32.xlu0 %v1133_v22, %s1057_s15 }
  0xe2   : > { %v497_v23 = vpop.permute.xlu1 %496  ;;  %v572_v36 = vpop.permute.xlu2 %571 }
  0xe3   : > { %307 = vrot.lane.b32.xlu1 %v1119_v11, %s1058_s16  ;;  %802 = vrot.lane.b32.xlu2 %v798_v35, %s1056_s14  ;;  %v528_v37 = vpop.permute.xlu0 %527  ;;  %v503_v38 = vsel %vm502_vm14, %v497_v23, %v499_v62  ;;  %vm685_vm14 = vcmask 621568   ;;  %v1059_v23 = vmov 0.0  }
  0xe4   : > { %v531_v39 = vsel %vm529_vm15, %v526_v16, %v528_v37  ;;  %v507_v40 = vsel %vm206_vm3, %v503_v38, 0.0  ;;  %224 = vst [vmem:[#allocation2 + $0x70] sm:$0xf0] %v1059_v23 }
  0xe5   : > { %535 = vst [vmem:[#allocation2 + $0x50] sm:$0xf] %v531_v39  ;;  %v511_v41 = vrot.slane %v507_v40, 4 }
  0xe6   : > { %225 = vst [vmem:[#allocation2 + $0xc0] sm:$0xf0] %v1059_v23 }
  0xe7   : > { %515 = vst [vmem:[#allocation2] sm:$0xf0] %v511_v41  ;;  %v1060_v41 = vmov 0.0|0.0  }
  0xe8   : > { %883 = vmatpush.bf16.msra.mxu0 %v1060_v41  ;;  %897 = vmatpush.bf16.msra.mxu1 %v1060_v41 }
  0xe9   : > { %311 = vrot.lane.b32.xlu0 %v1114_v10, %s1058_s16 }
  0xea   : > { %v524_v22 = vpop.permute.xlu1 %523  ;;  %v593_v42 = vpop.permute.xlu2 %592 }
  0xeb   : > { %286 = vrot.lane.b32.xlu1 %v1112_v9, %s1036_s19  ;;  %388 = vrot.lane.b32.xlu2 %v1131_v21, %s1039_s22  ;;  %v547_v11 = vpop.permute.xlu0 %546  ;;  %v530_v43 = vsel %vm529_vm15, %v524_v22, %v526_v16  ;;  %vm712_vm15 = vcmask 523264  }
  0xec   : > { %v550_v44 = vsel %vm548_vm2, %v545_v29, %v547_v11  ;;  %534 = vst [vmem:[#allocation2 + $0xa0] sm:$0xf] %v530_v43 }
  0xed   : > { %v554_v45 = vsel %vm215_vm9, %v550_v44, 0.0 }
  0xee   : > { %v558_v46 = vrot.slane %v554_v45, 4 }
  0xf0   : > { %562 = vst [vmem:[#allocation2 + $0x50] sm:$0xf0] %v558_v46 }
  0xf2   : > { %v543_v10 = vpop.permute.xlu1 %542  ;;  %v620_v48 = vpop.permute.xlu2 %619 }
  0xf3   : > { %410 = vrot.lane.b32.xlu2 %v1140_v24, %s1057_s15  ;;  %v574_v9 = vpop.permute.xlu0 %573  ;;  %v549_v21 = vsel %vm548_vm2, %v543_v10, %v545_v29  ;;  %vm733_vm2 = vcmask 515072  }
  0xf4   : > { %v577_v49 = vsel %vm575_vm5, %v572_v36, %v574_v9  ;;  %v553_v52 = vsel %vm214_vm12, %v549_v21, 0.0 }
  0xf5   : > { %v581_v53 = vsel %vm221_vm6, %v577_v49, 0.0  ;;  %v557_v54 = vrot.slane %v553_v52, 4 }
  0xf6   : > { %583 = vst [vmem:[#allocation2 + $0x80] sm:$0xf] %v581_v53 }
  0xf7   : > { %561 = vst [vmem:[#allocation2 + $0xa0] sm:$0xf0] %v557_v54 }
  0xfa   : > { %v570_v55 = vpop.permute.xlu1 %569  ;;  %v642_v56 = vpop.permute.xlu2 %641 }
  0xfb   : > { %v595_v57 = vpop.permute.xlu0 %594  ;;  %v576_v24 = vsel %vm575_vm5, %v570_v55, %v572_v36  ;;  %309 = vrot.lane.b32.xlu2 %v1121_v12, %s1058_s16  ;;  %vm779_vm5 = vcmask 498688  }
  0xfc   : > { %v598_v58 = vsel %vm596_vm8, %v593_v42, %v595_v57  ;;  %v580_v59 = vsel %vm220_vm7, %v576_v24, 0.0 }
  0xfd   : > { %v602_v60 = vsel %vm201_vm1, %v598_v58, 0.0  ;;  %582 = vst [vmem:[#allocation2 + $0x30] sm:$0xf] %v580_v59 }
  0xfe   : > { %v606_v61 = vrot.slane %v602_v60, 4 }
 0x100   : > { %610 = vst [vmem:[#allocation2 + $0x80] sm:$0xf0] %v606_v61 }
 0x102   : > { %v591_v62 = vpop.permute.xlu1 %590 }
 0x103   : > { %v622_v63 = vpop.permute.xlu0 %621  ;;  %v597_v2 = vsel %vm596_vm8, %v591_v62, %v593_v42  ;;  %288 = vrot.lane.b32.xlu2 %v1109_v7, %s1036_s19  ;;  %vm806_vm8 = vcmask 490496  }
 0x104   : > { %v625_v3 = vsel %vm623_vm10, %v620_v48, %v622_v63  ;;  %v601_v12 = vsel %vm200_vm0, %v597_v2, 0.0  ;;  %v661_v4 = vpop.permute.xlu2 %660 }
 0x105   : > { %v629_v1 = vsel %vm207_vm4, %v625_v3, 0.0  ;;  %v605_v5 = vrot.slane %v601_v12, 4 }
 0x106   : > { %631 = vst [vmem:[#allocation2 + $0x90] sm:$0xf] %v629_v1 }
 0x107   : > { %609 = vst [vmem:[#allocation2 + $0x30] sm:$0xf0] %v605_v5 }
 0x10a   : > { %v618_v6 = vpop.permute.xlu1 %617 }
 0x10b   : > { %v644_v8 = vpop.permute.xlu0 %643  ;;  %v624_v13 = vsel %vm623_vm10, %v618_v6, %v620_v48 }
 0x10c   : > { %v647_v14 = vsel %vm645_vm11, %v642_v56, %v644_v8  ;;  %v628_v16 = vsel %vm206_vm3, %v624_v13, 0.0 }
 0x10d   : > { %651 = vst [vmem:[#allocation2 + $0x90] sm:$0xf0] %v647_v14  ;;  %v682_v7 = vpop.permute.xlu2 %681 }
 0x10e   : > { %630 = vst [vmem:[#allocation2 + $0x68] sm:$0xf] %v628_v16 }
 0x113   : > { %v663_v17 = vpop.permute.xlu0 %662 }
 0x114   : > { %v666_v18 = vsel %vm664_vm13, %v661_v4, %v663_v17  ;;  %v640_v20 = vpop.permute.xlu1 %639 }
 0x115   : > { %v670_v25 = vsel %vm215_vm9, %v666_v18, 0.0  ;;  %v646_v26 = vsel %vm645_vm11, %v640_v20, %v642_v56  ;;  %v709_v27 = vpop.permute.xlu2 %708 }
 0x116   : > { %672 = vst [vmem:[#allocation2 + $0xe8] sm:$0xf] %v670_v25 }
 0x117   : > { %650 = vst [vmem:[#allocation2 + $0x68] sm:$0xf0] %v646_v26 }
 0x11b   : > { %v684_v28 = vpop.permute.xlu0 %683 }
 0x11c   : > { %v687_v0 = vsel %vm685_vm14, %v682_v7, %v684_v28 }
 0x11d   : > { %v691_v29 = vsel %vm221_vm6, %v687_v0, 0.0  ;;  %v659_v30 = vpop.permute.xlu1 %658  ;;  %v730_v31 = vpop.permute.xlu2 %729  ;;  %v865_v0 = vld [vmem:[%s1352_s2] sm:$0xff] }
 0x11e   : > { %v695_v32 = vrot.slane %v691_v29, 4  ;;  %v665_v33 = vsel %vm664_vm13, %v659_v30, %v661_v4  ;;  %v866_v29 = vld [vmem:[%s1352_s2 + $0x8] sm:$0xff] }
 0x11f   : > { %v669_v19 = vsel %vm214_vm12, %v665_v33, 0.0 }
 0x120   : > { %699 = vst [vmem:[#allocation2 + $0xe8] sm:$0xf0] %v695_v32 }
 0x121   : > { %671 = vst [vmem:[#allocation2 + $0xd0] sm:$0xf] %v669_v19 }
 0x123   : > { %v711_v34 = vpop.permute.xlu0 %710 }
 0x124   : > { %v714_v35 = vsel %vm712_vm15, %v709_v27, %v711_v34 }
 0x125   : > { %v718_v36 = vsel %vm201_vm1, %v714_v35, 0.0  ;;  %v680_v37 = vpop.permute.xlu1 %679  ;;  %v757_v38 = vpop.permute.xlu2 %756  ;;  %vm760_vm1 = vcmask 506880  }
 0x126   : > { %720 = vst [vmem:[#allocation2 + $0xb8] sm:$0xf] %v718_v36  ;;  %v686_v39 = vsel %vm685_vm14, %v680_v37, %v682_v7 }
 0x127   : > { %v690_v40 = vsel %vm220_vm7, %v686_v39, 0.0  ;;  %v836_v37 = vld [vmem:[#allocation2 + $0xe8] sm:$0xff] }
 0x128   : > { %v694_v22 = vrot.slane %v690_v40, 4  ;;  %v833_v40 = vld [vmem:[#allocation2 + $0x68] sm:$0xff] }
 0x12a   : > { %698 = vst [vmem:[#allocation2 + $0xd0] sm:$0xf0] %v694_v22  ;;  %v834_v22 = vld [vmem:[#allocation2 + $0x90] sm:$0xff] }
 0x12b   : > { %v732_v42 = vpop.permute.xlu0 %731 }
 0x12c   : > { %v735_v11 = vsel %vm733_vm2, %v730_v31, %v732_v42 }
 0x12d   : > { %v739_v43 = vsel %vm207_vm4, %v735_v11, 0.0  ;;  %v707_v44 = vpop.permute.xlu1 %706  ;;  %v776_v45 = vpop.permute.xlu2 %775 }
 0x12e   : > { %v743_v46 = vrot.slane %v739_v43, 4  ;;  %v713_v10 = vsel %vm712_vm15, %v707_v44, %v709_v27  ;;  %v858_v43 = vpack.c.bf16 %v836_v37, %v834_v22 }
 0x12f   : > { %v717_v48 = vsel %vm200_vm0, %v713_v10, 0.0  ;;  %vm392_vm0 = vcmask 908288  }
 0x130   : > { %747 = vst [vmem:[#allocation2 + $0xb8] sm:$0xf0] %v743_v46  ;;  %v832_v46 = vld [vmem:[#allocation2 + $0x80] sm:$0xff] }
 0x131   : > { %719 = vst [vmem:[#allocation2 + $0x60] sm:$0xf] %v717_v48  ;;  %v835_v36 = vld [vmem:[#allocation2 + $0xd0] sm:$0xff]  ;;  %v829_v48 = vld [vmem:[#allocation2 + $0xa0] sm:$0xff] }
 0x132   : > { %v857_v42 = vpack.c.bf16 %v835_v36, %v833_v40 }
 0x133   : > { %v759_v9 = vpop.permute.xlu0 %758 }
 0x134   : > { %v762_v21 = vsel %vm760_vm1, %v757_v38, %v759_v9  ;;  %v830_v9 = vld [vmem:[#allocation2 + $0x50] sm:$0xff] }
 0x135   : > { %766 = vst [vmem:[#allocation2 + $0x58] sm:$0xf] %v762_v21  ;;  %v728_v49 = vpop.permute.xlu1 %727  ;;  %v801_v52 = vpop.permute.xlu2 %800 }
 0x136   : > { %v734_v53 = vsel %vm733_vm2, %v728_v49, %v730_v31  ;;  %v1061_v31 = vmov 0   ;;  %v856_v49 = vpack.c.bf16 %v832_v46, %v830_v9 }
 0x137   : > { %v738_v54 = vsel %vm206_vm3, %v734_v53, 0.0  ;;  %1025 = vset.pattern.permute.xlu0 %v1061_v31  ;;  %1026 = vset.pattern.permute.xlu1 %v1061_v31  ;;  %v838_v19 = vld [vmem:[#allocation2 + $0xb8] sm:$0xff] }
 0x138   : > { %v742_v55 = vrot.slane %v738_v54, 4  ;;  %869 = vperm.xlu0 %1025, %v865_v0   ;;  %874 = vperm.xlu1 %1026, %v866_v29   ;;  %v827_v54 = vld [vmem:[#allocation2] sm:$0xff] }
 0x13a   : > { %746 = vst [vmem:[#allocation2 + $0x60] sm:$0xf0] %v742_v55 }
 0x13b   : > { %v778_v56 = vpop.permute.xlu0 %777 }
 0x13c   : > { %v781_v57 = vsel %vm779_vm5, %v776_v45, %v778_v56 }
 0x13d   : > { %v785_v24 = vsel %vm215_vm9, %v781_v57, 0.0  ;;  %v755_v58 = vpop.permute.xlu1 %754  ;;  %v803_v59 = vpop.permute.xlu2 %802 }
 0x13e   : > { %v789_v60 = vrot.slane %v785_v24, 4  ;;  %v761_v61 = vsel %vm760_vm1, %v755_v58, %v757_v38  ;;  %v807_v62 = vsel %vm806_vm8, %v801_v52, %v803_v59  ;;  %v828_v52 = vld [vmem:[#allocation2 + $0x88] sm:$0xff]  ;;  %v825_v24 = vld [vmem:[#allocation2 + $0xf8] sm:$0xff] }
 0x13f   : > { %765 = vst [vmem:[#allocation2 + $0xe0] sm:$0xf] %v761_v61  ;;  %v811_v63 = vsel %vm220_vm7, %v807_v62, 0.0  ;;  %v853_v62 = vpack.c.bf16 %v827_v54, %v825_v24 }
 0x140   : > { %793 = vst [vmem:[#allocation2 + $0x58] sm:$0xf0] %v789_v60 }
 0x141   : > { %813 = vst [vmem:[#allocation2 + $0x70] sm:$0xf] %v811_v63  ;;  %v837_v32 = vld [vmem:[#allocation2 + $0x60] sm:$0xff] }
 0x143   : > { %v805_v2 = vpop.permute.xlu0 %804 }
 0x144   : > { %v808_v3 = vsel %vm806_vm8, %v803_v59, %v805_v2  ;;  %v854_v59 = vpack.c.bf16 %v828_v52, %v826_v47 }
 0x145   : > { %v812_v12 = vsel %vm221_vm6, %v808_v3, 0.0  ;;  %v774_v4 = vpop.permute.xlu1 %773  ;;  %v389_v1 = vpop.permute.xlu2 %388  ;;  %vm414_vm6 = vcmask 900096  }
 0x146   : > { %814 = vst [vmem:[#allocation2 + $0xc0] sm:$0xf] %v812_v12  ;;  %v780_v5 = vsel %vm779_vm5, %v774_v4, %v776_v45  ;;  %v393_v6 = vsel %vm392_vm0, %v1204_v50, %v389_v1  ;;  %v831_v45 = vld [vmem:[#allocation2 + $0x30] sm:$0xff]  ;;  %v821_v12 = vld [vmem:[#allocation2 + $0x20] sm:$0xff] }
 0x147   : > { %v784_v8 = vsel %vm214_vm12, %v780_v5, 0.0  ;;  %v397_v13 = vsel %vm206_vm3, %v393_v6, 0.0  ;;  %v840_v30 = vld [vmem:[#allocation2 + $0x58] sm:$0xff]  ;;  %vm313_vm3 = vcmask 1022976   ;;  %v855_v21 = vpack.c.bf16 %v831_v45, %v829_v48  ;;  %v822_v4 = vld [vmem:[#allocation2 + $0xb0] sm:$0xff]  ;;  %v817_v5 = vld [vmem:[#allocation2 + $0x40] sm:$0xff] }
 0x148   : > { %v788_v14 = vrot.slane %v784_v8, 4  ;;  %399 = vst [vmem:[#allocation2 + $0xc8] sm:$0xf] %v397_v13  ;;  %v841_v16 = vld [vmem:[#allocation2 + $0x70] sm:$0xff]  ;;  %v860_v35 = vpack.c.bf16 %v840_v30, %v838_v19  ;;  %v818_v13 = vld [vmem:[#allocation2 + $0x48] sm:$0xff] }
 0x149   : > { %v861_v7 = vpack.c.bf16 0.0, %v841_v16 }
 0x14a   : > { %792 = vst [vmem:[#allocation2 + $0xe0] sm:$0xf0] %v788_v14 }
 0x14b   : > { %884 = vmatpush.bf16.msra.mxu0 %v861_v7  ;;  %v391_v17 = vpop.permute.xlu0 %390 }
 0x14c   : > { %v394_v18 = vsel %vm392_vm0, %v389_v1, %v391_v17 }
 0x14d   : > { %v398_v20 = vsel %vm207_vm4, %v394_v18, 0.0  ;;  %v409_v50 = vpop.permute.xlu1 %408  ;;  %v411_v25 = vpop.permute.xlu2 %410  ;;  %v842_v26 = vld [vmem:[#allocation2 + $0xc0] sm:$0xff]  ;;  %vm290_vm4 = vcmask 1031168  }
 0x14e   : > { %400 = vst [vmem:[#allocation2 + $0x38] sm:$0xf] %v398_v20  ;;  %v415_v27 = vsel %vm414_vm6, %v409_v50, %v411_v25  ;;  %v862_v28 = vpack.c.bf16 0.0, %v842_v26 }
 0x14f   : > { %419 = vst [vmem:[#allocation2 + $0xc8] sm:$0xf0] %v415_v27 }
 0x150   : > { %898 = vmatpush.bf16.msra.mxu1 %v862_v28 }
 0x151   : > { %v839_v33 = vld [vmem:[#allocation2 + $0xe0] sm:$0xff] }
 0x152   : > { %v859_v34 = vpack.c.bf16 %v839_v33, %v837_v32 }
 0x153   : > { %v413_v23 = vpop.permute.xlu0 %412 }
 0x154   : > { %885 = vmatpush.bf16.msra.mxu0 %v859_v34  ;;  %v416_v38 = vsel %vm414_vm6, %v411_v25, %v413_v23  ;;  %899 = vmatpush.bf16.msra.mxu1 %v860_v35 }
 0x155   : > { %420 = vst [vmem:[#allocation2 + $0x38] sm:$0xf0] %v416_v38  ;;  %v308_v39 = vpop.permute.xlu1 %307  ;;  %v310_v41 = vpop.permute.xlu2 %309 }
 0x156   : > { %v314_v11 = vsel %vm313_vm3, %v308_v39, %v310_v41  ;;  %v823_v2 = vld [vmem:[#allocation2 + $0xc8] sm:$0xff] }
 0x157   : > { %v318_v44 = vsel %vm214_vm12, %v314_v11, 0.0  ;;  %v851_v51 = vpack.c.bf16 %v823_v2, %v821_v12 }
 0x158   : > { %886 = vmatpush.bf16.msra.mxu0 %v857_v42  ;;  %v322_v10 = vrot.slane %v318_v44, 4  ;;  %900 = vmatpush.bf16.msra.mxu1 %v858_v43 }
 0x15a   : > { %326 = vst [vmem:[#allocation2 + $0xa8] sm:$0xf0] %v322_v10 }
 0x15b   : > { %v312_v53 = vpop.permute.xlu0 %311 }
 0x15c   : > { %887 = vmatpush.bf16.msra.mxu0 %v855_v21  ;;  %v315_v55 = vsel %vm313_vm3, %v310_v41, %v312_v53  ;;  %901 = vmatpush.bf16.msra.mxu1 %v856_v49  ;;  %v824_v3 = vld [vmem:[#allocation2 + $0x38] sm:$0xff] }
 0x15d   : > { %v319_v56 = vsel %vm215_vm9, %v315_v55, 0.0  ;;  %v287_v57 = vpop.permute.xlu1 %286  ;;  %v289_v58 = vpop.permute.xlu2 %288  ;;  %v852_v1 = vpack.c.bf16 %v824_v3, %v822_v4 }
 0x15e   : > { %v323_v60 = vrot.slane %v319_v56, 4  ;;  %v291_v61 = vsel %vm290_vm4, %v1180_v15, %v287_v57  ;;  %v292_v63 = vsel %vm290_vm4, %v287_v57, %v289_v58  ;;  %v989_v15 = vld [vmem:[%s1351_s1] sm:$0xff] }
 0x15f   : > { %295 = vst [vmem:[#allocation2 + $0xa8] sm:$0xf] %v291_v61 }
 0x160   : > { %327 = vst [vmem:[#allocation2 + $0x78] sm:$0xf0] %v323_v60  ;;  %888 = vmatpush.bf16.msra.mxu0 %v853_v62  ;;  %902 = vmatpush.bf16.msra.mxu1 %v854_v59 }
 0x161   : > { %296 = vst [vmem:[#allocation2 + $0x78] sm:$0xf] %v292_v63 }
 0x164   : > { %889 = vmatpush.bf16.msra.mxu0 %v851_v51  ;;  %903 = vmatpush.bf16.msra.mxu1 %v852_v1 }
 0x166   : > { %v819_v6 = vld [vmem:[#allocation2 + $0xa8] sm:$0xff] }
 0x167   : > { %v849_v8 = vpack.c.bf16 %v819_v6, %v817_v5 }
 0x168   : > { %v820_v14 = vld [vmem:[#allocation2 + $0x78] sm:$0xff] }
 0x169   : > { %890 = vmatpush.bf16.msra.mxu0 %v849_v8  ;;  %v850_v16 = vpack.c.bf16 %v820_v14, %v818_v13 }
 0x16b   : > { %904 = vmatpush.bf16.msra.mxu1 %v850_v16 }
 0x16c   : > { %891 = vmatmul.bf16.vlgmr.msra.gmra.mxu0 %v989_v15 }
 0x16e   : > { %905 = vmatmul.bf16.vlgmr.msra.gmra.mxu1 %v989_v15 }
 0x1aa   : > { %v870_v7 = vpop.permute.xlu0 %869  ;;  %v875_v27 = vpop.permute.xlu1 %874 }
 0x1e9   : > { %v892_v17 = vpop.f32.mrf.mxu0 }
 0x1ea   : > { %v893_v18 = vadd.f32 %v892_v17, %v870_v7 }
 0x1eb   : > { %v906_v20 = vpop.f32.mrf.mxu1 }
 0x1ec   : > { %v911_v50 = vmax.f32 %v893_v18, 0.0  ;;  %v907_v25 = vadd.f32 %v906_v20, %v870_v7 }
 0x1ee   : > { %915 = vst [vmem:[%s170_s26] sm:$0xff] %v911_v50  ;;  %v912_v26 = vmax.f32 %v907_v25, 0.0 }
 0x1f0   : > { %916 = vst [vmem:[%s170_s26 + $0x8] sm:$0xff] %v912_v26 }
 0x1f1   : > { %v894_v28 = vpop.f32.mrf.mxu0 }
 0x1f2   : > { %v895_v0 = vadd.f32 %v894_v28, %v875_v27 }
 0x1f3   : > { %v908_v29 = vpop.f32.mrf.mxu1 }
 0x1f4   : > { %v913_v30 = vmax.f32 %v895_v0, 0.0  ;;  %v909_v31 = vadd.f32 %v908_v29, %v875_v27 }
 0x1f6   : > { %917 = vst [vmem:[%s170_s26 + $0x10] sm:$0xff] %v913_v30  ;;  %v914_v32 = vmax.f32 %v909_v31, 0.0 }
 0x1f8   : > { %918 = vst [vmem:[%s170_s26 + $0x18] sm:$0xff] %v914_v32 }
 0x1f9 PF: > { %s13_s12 = sadd.s32 1, %s1033_s12  }
 0x1fa   : > { %p10_p4 = scmp.ge.s32.totalorder %s13_s12, 4  }
 0x1fc   :  { %12 = sbr.rel (!%p10_p4) target bundleno = 1 (0x1), region = 88 }

</bundles_post_ra>
